<compile_context>
chip_gen: v7x
topology: tpu7x:2x2x1
jax: 0.10.0
libtpu: 0.0.40
codegen_flags: <defaults>
</compile_context>

<pallas_src>
import math

import jax
import jax.numpy as jnp
from jax import lax
from jax.experimental import pallas as pl
from jax.experimental.pallas import tpu as pltpu

_INV_SQRT2 = 1.0 / math.sqrt(2.0)
_LN_EPS = 1e-5  # torch.nn.LayerNorm default


def _round_up(x: int, m: int) -> int:
    return ((x + m - 1) // m) * m


def _chip_info():
    """Best-effort (physical_vmem_bytes, tensorcores_per_chip) from the device kind."""
    vmem = 128 * 1024 * 1024   # v5e / v6e
    cores = 1
    try:
        kind = (jax.devices()[0].device_kind or "").lower()
    except Exception:
        kind = ""
    if "v7" in kind:
        vmem = 64 * 1024 * 1024
        cores = 2
    return vmem, cores


def _head_kernel(x_ref, w1_ref, b1_ref, g_ref, beta_ref, w2_ref, b2_ref, o_ref):
    # x_ref: (TM, D), w1_ref: (D, 2D), b1/g/beta: (1, 2D) f32,
    # w2_ref: (2D, Cp), b2_ref: (1, Cp) f32, o_ref: (TM, Cp)

    # Linear 1: native-dtype MXU matmul, f32 accumulation.
    h = jnp.dot(x_ref[...], w1_ref[...], preferred_element_type=jnp.float32)
    h = h + b1_ref[...]

    # Exact (erf-based) GELU, matching torch.nn.GELU default numerics.
    h = 0.5 * h * (1.0 + lax.erf(h * _INV_SQRT2))

    # LayerNorm over last dim (two-pass variance for numerical safety), affine params.
    mu = jnp.mean(h, axis=-1, keepdims=True)
    hc = h - mu
    var = jnp.mean(hc * hc, axis=-1, keepdims=True)
    h = hc * lax.rsqrt(var + _LN_EPS)
    h = h * g_ref[...] + beta_ref[...]

    # Dropout(p=0.0) is identity -> nothing to do.

    # Linear 2: cast activations to the weight dtype so bf16 weights hit the fast MXU path.
    out = jnp.dot(h.astype(w2_ref.dtype), w2_ref[...], preferred_element_type=jnp.float32)
    out = out + b2_ref[...]

    o_ref[...] = out.astype(o_ref.dtype)


def _choose_row_tile(M, sub, tile_m, hidden, num_tc):
    """Balanced, sublane-aligned row tile; >=2 grid steps on multi-TC chips when possible."""
    eff = tile_m
    if hidden >= 2048:
        # Keep the (tm, hidden) f32 intermediate (and its spill traffic) small.
        eff = min(eff, 256)
    eff = max(eff, sub)
    n_tiles = pl.cdiv(M, eff)
    if num_tc >= 2 and M > 2 * sub:
        # Give the 'parallel' row axis at least one step per TensorCore (v7x).
        n_tiles = max(n_tiles, num_tc)
    tm = _round_up(pl.cdiv(M, n_tiles), sub)
    grid_m = pl.cdiv(M, tm)
    return tm, grid_m


def classification_head(x, params, *, tile_m=512, mxu_bf16=False):
    """x: [..., model_dim]  ->  [..., num_classes]"""
    w1, b1, gamma, beta, w2, b2 = params
    model_dim, hidden = w1.shape
    num_classes = w2.shape[1]

    orig_shape = x.shape
    xf = x.reshape(-1, model_dim)
    M = xf.shape[0]
    out_dtype = x.dtype

    # Sublane multiple: 8 for f32, 16 for bf16, 32 for int8.
    sub = max(8, 32 // jnp.dtype(x.dtype).itemsize)

    phys_vmem, num_tc = _chip_info()
    vmem_limit = min(int(0.8 * phys_vmem), 100 * 1024 * 1024)

    tm, grid_m = _choose_row_tile(M, sub, tile_m, hidden, num_tc)
    Mp = grid_m * tm
    if Mp != M:
        xf = jnp.pad(xf, ((0, Mp - M), (0, 0)))

    # Lane-dense output: pad the class dim to a multiple of 128 with zero weights/bias
    # so the output stores are full unmasked vst's; padding is sliced off afterwards.
    c_pad = _round_up(num_classes, 128)
    if c_pad != num_classes:
        w2p = jnp.pad(w2, ((0, 0), (0, c_pad - num_classes)))
        b2p = jnp.pad(b2, (0, c_pad - num_classes))
    else:
        w2p, b2p = w2, b2

    # Optional bf16 MXU operands (f32 accumulation + f32 bias/LN math retained).
    if mxu_bf16 and jnp.dtype(x.dtype) == jnp.float32:
        xf = xf.astype(jnp.bfloat16)
        w1 = w1.astype(jnp.bfloat16)
        w2p = w2p.astype(jnp.bfloat16)

    # Small params pre-cast to f32 once (elementwise math is f32 inside the kernel).
    b1_2d = b1.reshape(1, hidden).astype(jnp.float32)
    g_2d = gamma.reshape(1, hidden).astype(jnp.float32)
    be_2d = beta.reshape(1, hidden).astype(jnp.float32)
    b2_2d = b2p.reshape(1, c_pad).astype(jnp.float32)

    def _build_specs(single_buffer):
        kw = {"pipeline_mode": pl.Buffered(1)} if single_buffer else {}
        const = lambda shape: pl.BlockSpec(shape, lambda i: (0, 0), **kw)
        in_specs = [
            pl.BlockSpec((tm, model_dim), lambda i: (i, 0)),   # x tile (double-buffered)
            const((model_dim, hidden)),                        # w1 (resident, single-buffered)
            const((1, hidden)),                                # b1
            const((1, hidden)),                                # ln gamma
            const((1, hidden)),                                # ln beta
            const((hidden, c_pad)),                            # w2 (resident, single-buffered)
            const((1, c_pad)),                                 # b2
        ]
        out_spec = pl.BlockSpec((tm, c_pad), lambda i: (i, 0))
        return in_specs, out_spec

    def _run(single_buffer):
        in_specs, out_spec = _build_specs(single_buffer)
        return pl.pallas_call(
            _head_kernel,
            out_shape=jax.ShapeDtypeStruct((Mp, c_pad), out_dtype),
            grid_spec=pltpu.PrefetchScalarGridSpec(
                num_scalar_prefetch=0,
                grid=(grid_m,),
                in_specs=in_specs,
                out_specs=out_spec,
            ),
            compiler_params=pltpu.CompilerParams(
                dimension_semantics=("parallel",),
                vmem_limit_bytes=vmem_limit,
            ),
        )(xf, w1, b1_2d, g_2d, be_2d, w2p, b2_2d)

    try:
        out = _run(single_buffer=True)
    except Exception:
        # Older JAX without BlockSpec pipeline_mode / Buffered(1): fall back to defaults.
        out = _run(single_buffer=False)

    out = out[:M, :num_classes]
    return out.reshape(*orig_shape[:-1], num_classes)


def init_params(key, model_dim=256, num_classes=10, dtype=jnp.float32):
    hidden = 2 * model_dim
    k1, k2, k3, k4 = jax.random.split(key, 4)
    # Deterministic init mimicking nn.Linear's uniform(-1/sqrt(fan_in), 1/sqrt(fan_in)).
    lim1 = 1.0 / math.sqrt(model_dim)
    lim2 = 1.0 / math.sqrt(hidden)
    w1 = jax.random.uniform(k1, (model_dim, hidden), dtype, -lim1, lim1)
    b1 = jax.random.uniform(k2, (hidden,), dtype, -lim1, lim1)
    gamma = jnp.ones((hidden,), dtype)   # LayerNorm weight init
    beta = jnp.zeros((hidden,), dtype)   # LayerNorm bias init
    w2 = jax.random.uniform(k3, (hidden, num_classes), dtype, -lim2, lim2)
    b2 = jax.random.uniform(k4, (num_classes,), dtype, -lim2, lim2)
    return (w1, b1, gamma, beta, w2, b2)


def _ref_forward(x, params):
    """Pure-JAX reference of the PyTorch module (for sanity check)."""
    w1, b1, gamma, beta, w2, b2 = params
    h = x @ w1 + b1
    h = 0.5 * h * (1.0 + lax.erf(h / math.sqrt(2.0)))
    mu = jnp.mean(h, -1, keepdims=True)
    var = jnp.mean((h - mu) ** 2, -1, keepdims=True)
    h = (h - mu) / jnp.sqrt(var + _LN_EPS) * gamma + beta
    return h @ w2 + b2


if __name__ == "__main__":
    key = jax.random.PRNGKey(0)
    kx, kp = jax.random.split(key)

    model_dim, num_classes = 256, 10   # module defaults
    batch, seq = 2, 8
    x = jax.random.normal(kx, (batch, seq, model_dim), jnp.float32)

    params = init_params(kp, model_dim=model_dim, num_classes=num_classes)

    out = classification_head(x, params)
    out = jax.block_until_ready(out)

    ref = _ref_forward(x, params)
    assert out.shape == (batch, seq, num_classes), out.shape
    assert jnp.allclose(out, ref, atol=1e-4, rtol=1e-4), float(jnp.max(jnp.abs(out - ref)))

    print("KERNEL_OK")
</pallas_src>

<mosaic_0001>
module attributes {stable_mosaic.version = 11 : i64} {
  func.func @_head_kernel(%arg0: i32, %arg1: memref<16x256xf32, #tpu.memory_space<vmem>>, %arg2: memref<256x512xf32, #tpu.memory_space<vmem>>, %arg3: memref<1x512xf32, #tpu.memory_space<vmem>>, %arg4: memref<1x512xf32, #tpu.memory_space<vmem>>, %arg5: memref<1x512xf32, #tpu.memory_space<vmem>>, %arg6: memref<512x128xf32, #tpu.memory_space<vmem>>, %arg7: memref<1x128xf32, #tpu.memory_space<vmem>>, %arg8: memref<16x128xf32, #tpu.memory_space<vmem>>) attributes {dimension_semantics = [#tpu.dimension_semantics<parallel>], iteration_bounds = array<i64: 1>, scalar_prefetch = 0 : i64, scratch_operands = 0 : i64, tpu.core_type = #tpu.core_type<tc>, window_params = [{transform_indices = @transform_0, window_bounds = array<i64: 16, 256>}, {pipeline_mode = #tpu.pipeline_mode<synchronous>, transform_indices = @transform_1, window_bounds = array<i64: 256, 512>}, {pipeline_mode = #tpu.pipeline_mode<synchronous>, transform_indices = @transform_2, window_bounds = array<i64: 1, 512>}, {pipeline_mode = #tpu.pipeline_mode<synchronous>, transform_indices = @transform_3, window_bounds = array<i64: 1, 512>}, {pipeline_mode = #tpu.pipeline_mode<synchronous>, transform_indices = @transform_4, window_bounds = array<i64: 1, 512>}, {pipeline_mode = #tpu.pipeline_mode<synchronous>, transform_indices = @transform_5, window_bounds = array<i64: 512, 128>}, {pipeline_mode = #tpu.pipeline_mode<synchronous>, transform_indices = @transform_6, window_bounds = array<i64: 1, 128>}, {transform_indices = @transform_7, window_bounds = array<i64: 16, 128>}]} {
    %c0 = arith.constant 0 : index
    %c0_0 = arith.constant 0 : index
    %0 = vector.load %arg1[%c0, %c0_0] : memref<16x256xf32, #tpu.memory_space<vmem>>, vector<16x256xf32>
    %c0_1 = arith.constant 0 : index
    %c0_2 = arith.constant 0 : index
    %1 = vector.load %arg2[%c0_1, %c0_2] : memref<256x512xf32, #tpu.memory_space<vmem>>, vector<256x512xf32>
    %cst = arith.constant dense<0.000000e+00> : vector<16x512xf32>
    %2 = tpu.matmul %0, %1, %cst {dimension_numbers = #tpu.dot_dimension_numbers<[1], [0], [0], [1], [0, 0, 1, 1], [], []>} : vector<16x256xf32>, vector<256x512xf32>, vector<16x512xf32> -> vector<16x512xf32>
    %c0_3 = arith.constant 0 : index
    %c0_4 = arith.constant 0 : index
    %3 = vector.load %arg3[%c0_3, %c0_4] : memref<1x512xf32, #tpu.memory_space<vmem>>, vector<1x512xf32>
    %4 = vector.broadcast %3 : vector<1x512xf32> to vector<16x512xf32>
    %5 = arith.addf %2, %4 : vector<16x512xf32>
    %cst_5 = arith.constant 5.000000e-01 : f32
    %6 = vector.broadcast %cst_5 : f32 to vector<16x512xf32>
    %7 = arith.mulf %6, %5 : vector<16x512xf32>
    %cst_6 = arith.constant 0.707106769 : f32
    %8 = vector.broadcast %cst_6 : f32 to vector<16x512xf32>
    %9 = arith.mulf %5, %8 : vector<16x512xf32>
    %10 = math.erf %9 : vector<16x512xf32>
    %cst_7 = arith.constant 1.000000e+00 : f32
    %11 = vector.broadcast %cst_7 : f32 to vector<16x512xf32>
    %12 = arith.addf %11, %10 : vector<16x512xf32>
    %13 = arith.mulf %7, %12 : vector<16x512xf32>
    %cst_8 = arith.constant dense<0.000000e+00> : vector<16xf32>
    %14 = vector.multi_reduction <add>, %13, %cst_8 [1] : vector<16x512xf32> to vector<16xf32>
    %15 = vector.shape_cast %14 : vector<16xf32> to vector<16x1xf32>
    %cst_9 = arith.constant 5.120000e+02 : f32
    %16 = vector.broadcast %cst_9 : f32 to vector<16x1xf32>
    %17 = arith.divf %15, %16 : vector<16x1xf32>
    %18 = vector.broadcast %17 : vector<16x1xf32> to vector<16x512xf32>
    %19 = arith.subf %13, %18 : vector<16x512xf32>
    %20 = arith.mulf %19, %19 : vector<16x512xf32>
    %cst_10 = arith.constant dense<0.000000e+00> : vector<16xf32>
    %21 = vector.multi_reduction <add>, %20, %cst_10 [1] : vector<16x512xf32> to vector<16xf32>
    %22 = vector.shape_cast %21 : vector<16xf32> to vector<16x1xf32>
    %cst_11 = arith.constant 5.120000e+02 : f32
    %23 = vector.broadcast %cst_11 : f32 to vector<16x1xf32>
    %24 = arith.divf %22, %23 : vector<16x1xf32>
    %cst_12 = arith.constant 9.99999974E-6 : f32
    %25 = vector.broadcast %cst_12 : f32 to vector<16x1xf32>
    %26 = arith.addf %24, %25 : vector<16x1xf32>
    %27 = math.rsqrt %26 : vector<16x1xf32>
    %28 = vector.broadcast %27 : vector<16x1xf32> to vector<16x512xf32>
    %29 = arith.mulf %19, %28 : vector<16x512xf32>
    %c0_13 = arith.constant 0 : index
    %c0_14 = arith.constant 0 : index
    %30 = vector.load %arg4[%c0_13, %c0_14] : memref<1x512xf32, #tpu.memory_space<vmem>>, vector<1x512xf32>
    %31 = vector.broadcast %30 : vector<1x512xf32> to vector<16x512xf32>
    %32 = arith.mulf %29, %31 : vector<16x512xf32>
    %c0_15 = arith.constant 0 : index
    %c0_16 = arith.constant 0 : index
    %33 = vector.load %arg5[%c0_15, %c0_16] : memref<1x512xf32, #tpu.memory_space<vmem>>, vector<1x512xf32>
    %34 = vector.broadcast %33 : vector<1x512xf32> to vector<16x512xf32>
    %35 = arith.addf %32, %34 : vector<16x512xf32>
    %c0_17 = arith.constant 0 : index
    %c0_18 = arith.constant 0 : index
    %36 = vector.load %arg6[%c0_17, %c0_18] : memref<512x128xf32, #tpu.memory_space<vmem>>, vector<512x128xf32>
    %cst_19 = arith.constant dense<0.000000e+00> : vector<16x128xf32>
    %37 = tpu.matmul %35, %36, %cst_19 {dimension_numbers = #tpu.dot_dimension_numbers<[1], [0], [0], [1], [0, 0, 1, 1], [], []>} : vector<16x512xf32>, vector<512x128xf32>, vector<16x128xf32> -> vector<16x128xf32>
    %c0_20 = arith.constant 0 : index
    %c0_21 = arith.constant 0 : index
    %38 = vector.load %arg7[%c0_20, %c0_21] : memref<1x128xf32, #tpu.memory_space<vmem>>, vector<1x128xf32>
    %39 = vector.broadcast %38 : vector<1x128xf32> to vector<16x128xf32>
    %40 = arith.addf %37, %39 : vector<16x128xf32>
    %c0_22 = arith.constant 0 : index
    %c0_23 = arith.constant 0 : index
    %41 = vector.load %arg8[%c0_22, %c0_23] : memref<16x128xf32, #tpu.memory_space<vmem>>, vector<16x128xf32>
    tpu.vector_store %arg8[%c0_22, %c0_23], %40 {strides = array<i32>} : memref<16x128xf32, #tpu.memory_space<vmem>>, vector<16x128xf32>,
    return
  }
  func.func @transform_0(%arg0: i32) -> (i32, i32) {
    %c0_i32 = arith.constant 0 : i32
    %c0_i32_0 = arith.constant 0 : i32
    return %arg0, %c0_i32 : i32, i32
  }
  func.func @transform_1(%arg0: i32) -> (i32, i32) {
    %c0_i32 = arith.constant 0 : i32
    %c0_i32_0 = arith.constant 0 : i32
    %c0_i32_1 = arith.constant 0 : i32
    return %c0_i32, %c0_i32_0 : i32, i32
  }
  func.func @transform_2(%arg0: i32) -> (i32, i32) {
    %c0_i32 = arith.constant 0 : i32
    %c0_i32_0 = arith.constant 0 : i32
    %c0_i32_1 = arith.constant 0 : i32
    return %c0_i32, %c0_i32_0 : i32, i32
  }
  func.func @transform_3(%arg0: i32) -> (i32, i32) {
    %c0_i32 = arith.constant 0 : i32
    %c0_i32_0 = arith.constant 0 : i32
    %c0_i32_1 = arith.constant 0 : i32
    return %c0_i32, %c0_i32_0 : i32, i32
  }
  func.func @transform_4(%arg0: i32) -> (i32, i32) {
    %c0_i32 = arith.constant 0 : i32
    %c0_i32_0 = arith.constant 0 : i32
    %c0_i32_1 = arith.constant 0 : i32
    return %c0_i32, %c0_i32_0 : i32, i32
  }
  func.func @transform_5(%arg0: i32) -> (i32, i32) {
    %c0_i32 = arith.constant 0 : i32
    %c0_i32_0 = arith.constant 0 : i32
    %c0_i32_1 = arith.constant 0 : i32
    return %c0_i32, %c0_i32_0 : i32, i32
  }
  func.func @transform_6(%arg0: i32) -> (i32, i32) {
    %c0_i32 = arith.constant 0 : i32
    %c0_i32_0 = arith.constant 0 : i32
    %c0_i32_1 = arith.constant 0 : i32
    return %c0_i32, %c0_i32_0 : i32, i32
  }
  func.func @transform_7(%arg0: i32) -> (i32, i32) {
    %c0_i32 = arith.constant 0 : i32
    %c0_i32_0 = arith.constant 0 : i32
    return %arg0, %c0_i32 : i32, i32
  }
}

module attributes {stable_mosaic.version = 11 : i64} {
  func.func @_head_kernel(%arg0: i32, %arg1: memref<16x256xf32, #tpu.memory_space<vmem>>, %arg2: memref<256x512xf32, #tpu.memory_space<vmem>>, %arg3: memref<1x512xf32, #tpu.memory_space<vmem>>, %arg4: memref<1x512xf32, #tpu.memory_space<vmem>>, %arg5: memref<1x512xf32, #tpu.memory_space<vmem>>, %arg6: memref<512x128xf32, #tpu.memory_space<vmem>>, %arg7: memref<1x128xf32, #tpu.memory_space<vmem>>, %arg8: memref<16x128xf32, #tpu.memory_space<vmem>>) attributes {dimension_semantics = [#tpu.dimension_semantics<parallel>], iteration_bounds = array<i64: 1>, scalar_prefetch = 0 : i64, scratch_operands = 0 : i64, tpu.core_type = #tpu.core_type<tc>, window_params = [{transform_indices = @transform_0, window_bounds = array<i64: 16, 256>}, {pipeline_mode = #tpu.pipeline_mode<synchronous>, transform_indices = @transform_1, window_bounds = array<i64: 256, 512>}, {pipeline_mode = #tpu.pipeline_mode<synchronous>, transform_indices = @transform_2, window_bounds = array<i64: 1, 512>}, {pipeline_mode = #tpu.pipeline_mode<synchronous>, transform_indices = @transform_3, window_bounds = array<i64: 1, 512>}, {pipeline_mode = #tpu.pipeline_mode<synchronous>, transform_indices = @transform_4, window_bounds = array<i64: 1, 512>}, {pipeline_mode = #tpu.pipeline_mode<synchronous>, transform_indices = @transform_5, window_bounds = array<i64: 512, 128>}, {pipeline_mode = #tpu.pipeline_mode<synchronous>, transform_indices = @transform_6, window_bounds = array<i64: 1, 128>}, {transform_indices = @transform_7, window_bounds = array<i64: 16, 128>}]} {
    %c0 = arith.constant 0 : index
    %c0_0 = arith.constant 0 : index
    %0 = vector.load %arg1[%c0, %c0_0] : memref<16x256xf32, #tpu.memory_space<vmem>>, vector<16x256xf32>
    %c0_1 = arith.constant 0 : index
    %c0_2 = arith.constant 0 : index
    %1 = vector.load %arg2[%c0_1, %c0_2] : memref<256x512xf32, #tpu.memory_space<vmem>>, vector<256x512xf32>
    %cst = arith.constant dense<0.000000e+00> : vector<16x512xf32>
    %2 = tpu.matmul %0, %1, %cst {dimension_numbers = #tpu.dot_dimension_numbers<[1], [0], [0], [1], [0, 0, 1, 1], [], []>} : vector<16x256xf32>, vector<256x512xf32>, vector<16x512xf32> -> vector<16x512xf32>
    %c0_3 = arith.constant 0 : index
    %c0_4 = arith.constant 0 : index
    %3 = vector.load %arg3[%c0_3, %c0_4] : memref<1x512xf32, #tpu.memory_space<vmem>>, vector<1x512xf32>
    %4 = vector.broadcast %3 : vector<1x512xf32> to vector<16x512xf32>
    %5 = arith.addf %2, %4 : vector<16x512xf32>
    %cst_5 = arith.constant 5.000000e-01 : f32
    %6 = vector.broadcast %cst_5 : f32 to vector<16x512xf32>
    %7 = arith.mulf %6, %5 : vector<16x512xf32>
    %cst_6 = arith.constant 0.707106769 : f32
    %8 = vector.broadcast %cst_6 : f32 to vector<16x512xf32>
    %9 = arith.mulf %5, %8 : vector<16x512xf32>
    %10 = math.erf %9 : vector<16x512xf32>
    %cst_7 = arith.constant 1.000000e+00 : f32
    %11 = vector.broadcast %cst_7 : f32 to vector<16x512xf32>
    %12 = arith.addf %11, %10 : vector<16x512xf32>
    %13 = arith.mulf %7, %12 : vector<16x512xf32>
    %cst_8 = arith.constant dense<0.000000e+00> : vector<16xf32>
    %14 = vector.multi_reduction <add>, %13, %cst_8 [1] : vector<16x512xf32> to vector<16xf32>
    %15 = vector.shape_cast %14 : vector<16xf32> to vector<16x1xf32>
    %cst_9 = arith.constant 5.120000e+02 : f32
    %16 = vector.broadcast %cst_9 : f32 to vector<16x1xf32>
    %17 = arith.divf %15, %16 : vector<16x1xf32>
    %18 = vector.broadcast %17 : vector<16x1xf32> to vector<16x512xf32>
    %19 = arith.subf %13, %18 : vector<16x512xf32>
    %20 = arith.mulf %19, %19 : vector<16x512xf32>
    %cst_10 = arith.constant dense<0.000000e+00> : vector<16xf32>
    %21 = vector.multi_reduction <add>, %20, %cst_10 [1] : vector<16x512xf32> to vector<16xf32>
    %22 = vector.shape_cast %21 : vector<16xf32> to vector<16x1xf32>
    %cst_11 = arith.constant 5.120000e+02 : f32
    %23 = vector.broadcast %cst_11 : f32 to vector<16x1xf32>
    %24 = arith.divf %22, %23 : vector<16x1xf32>
    %cst_12 = arith.constant 9.99999974E-6 : f32
    %25 = vector.broadcast %cst_12 : f32 to vector<16x1xf32>
    %26 = arith.addf %24, %25 : vector<16x1xf32>
    %27 = math.rsqrt %26 : vector<16x1xf32>
    %28 = vector.broadcast %27 : vector<16x1xf32> to vector<16x512xf32>
    %29 = arith.mulf %19, %28 : vector<16x512xf32>
    %c0_13 = arith.constant 0 : index
    %c0_14 = arith.constant 0 : index
    %30 = vector.load %arg4[%c0_13, %c0_14] : memref<1x512xf32, #tpu.memory_space<vmem>>, vector<1x512xf32>
    %31 = vector.broadcast %30 : vector<1x512xf32> to vector<16x512xf32>
    %32 = arith.mulf %29, %31 : vector<16x512xf32>
    %c0_15 = arith.constant 0 : index
    %c0_16 = arith.constant 0 : index
    %33 = vector.load %arg5[%c0_15, %c0_16] : memref<1x512xf32, #tpu.memory_space<vmem>>, vector<1x512xf32>
    %34 = vector.broadcast %33 : vector<1x512xf32> to vector<16x512xf32>
    %35 = arith.addf %32, %34 : vector<16x512xf32>
    %c0_17 = arith.constant 0 : index
    %c0_18 = arith.constant 0 : index
    %36 = vector.load %arg6[%c0_17, %c0_18] : memref<512x128xf32, #tpu.memory_space<vmem>>, vector<512x128xf32>
    %cst_19 = arith.constant dense<0.000000e+00> : vector<16x128xf32>
    %37 = tpu.matmul %35, %36, %cst_19 {dimension_numbers = #tpu.dot_dimension_numbers<[1], [0], [0], [1], [0, 0, 1, 1], [], []>} : vector<16x512xf32>, vector<512x128xf32>, vector<16x128xf32> -> vector<16x128xf32>
    %c0_20 = arith.constant 0 : index
    %c0_21 = arith.constant 0 : index
    %38 = vector.load %arg7[%c0_20, %c0_21] : memref<1x128xf32, #tpu.memory_space<vmem>>, vector<1x128xf32>
    %39 = vector.broadcast %38 : vector<1x128xf32> to vector<16x128xf32>
    %40 = arith.addf %37, %39 : vector<16x128xf32>
    %c0_22 = arith.constant 0 : index
    %c0_23 = arith.constant 0 : index
    %41 = vector.load %arg8[%c0_22, %c0_23] : memref<16x128xf32, #tpu.memory_space<vmem>>, vector<16x128xf32>
    tpu.vector_store %arg8[%c0_22, %c0_23], %40 {strides = array<i32>} : memref<16x128xf32, #tpu.memory_space<vmem>>, vector<16x128xf32>,
    return
  }
  func.func @transform_0(%arg0: i32) -> (i32, i32) {
    %c0_i32 = arith.constant 0 : i32
    %c0_i32_0 = arith.constant 0 : i32
    return %arg0, %c0_i32 : i32, i32
  }
  func.func @transform_1(%arg0: i32) -> (i32, i32) {
    %c0_i32 = arith.constant 0 : i32
    %c0_i32_0 = arith.constant 0 : i32
    %c0_i32_1 = arith.constant 0 : i32
    return %c0_i32, %c0_i32_0 : i32, i32
  }
  func.func @transform_2(%arg0: i32) -> (i32, i32) {
    %c0_i32 = arith.constant 0 : i32
    %c0_i32_0 = arith.constant 0 : i32
    %c0_i32_1 = arith.constant 0 : i32
    return %c0_i32, %c0_i32_0 : i32, i32
  }
  func.func @transform_3(%arg0: i32) -> (i32, i32) {
    %c0_i32 = arith.constant 0 : i32
    %c0_i32_0 = arith.constant 0 : i32
    %c0_i32_1 = arith.constant 0 : i32
    return %c0_i32, %c0_i32_0 : i32, i32
  }
  func.func @transform_4(%arg0: i32) -> (i32, i32) {
    %c0_i32 = arith.constant 0 : i32
    %c0_i32_0 = arith.constant 0 : i32
    %c0_i32_1 = arith.constant 0 : i32
    return %c0_i32, %c0_i32_0 : i32, i32
  }
  func.func @transform_5(%arg0: i32) -> (i32, i32) {
    %c0_i32 = arith.constant 0 : i32
    %c0_i32_0 = arith.constant 0 : i32
    %c0_i32_1 = arith.constant 0 : i32
    return %c0_i32, %c0_i32_0 : i32, i32
  }
  func.func @transform_6(%arg0: i32) -> (i32, i32) {
    %c0_i32 = arith.constant 0 : i32
    %c0_i32_0 = arith.constant 0 : i32
    %c0_i32_1 = arith.constant 0 : i32
    return %c0_i32, %c0_i32_0 : i32, i32
  }
  func.func @transform_7(%arg0: i32) -> (i32, i32) {
    %c0_i32 = arith.constant 0 : i32
    %c0_i32_0 = arith.constant 0 : i32
    return %arg0, %c0_i32 : i32, i32
  }
}

</mosaic_0001>

<bundles_post_ra>
// kernel: tpu_custom_call.1
= control target key start
LH: loop header
LB: loop body
LE: loop exit
PB: predicated region body
PF: predicated region fallthrough
CT: control target
= control target key end

     0   :  { %12 = vsyncpa [#allocation3], 0  ;;  %s1555_s0 = inlined_call_operand.hbm [shape: f32[16,256], index: 0, kind: input, shape index: {}]   ;;  %s1556_s1 = inlined_call_operand.hbm [shape: f32[256,512], index: 1, kind: input, shape index: {}]   ;;  %s1557_s2 = inlined_call_operand.hbm [shape: f32[1,512], index: 2, kind: input, shape index: {}]   ;;  %s1558_s3 = inlined_call_operand.hbm [shape: f32[1,512], index: 3, kind: input, shape index: {}]   ;;  %s1559_s4 = inlined_call_operand.hbm [shape: f32[1,512], index: 4, kind: input, shape index: {}]   ;;  %s1560_s5 = inlined_call_operand.hbm [shape: f32[512,128], index: 5, kind: input, shape index: {}]   ;;  %s1561_s6 = inlined_call_operand.hbm [shape: f32[1,128], index: 6, kind: input, shape index: {}]   ;;  %s1562_s7 = inlined_call_operand.hbm [shape: f32[16,128], index: 7, kind: output, shape index: {}]  }
   0x1   :  { %13 = vsyncpa [#allocation6], 0 }
   0x2   :  { %14 = vsyncpa [#allocation9], 0 }
   0x3   :  { %15 = vsyncpa [#allocation12], 0 }
   0x4   :  { %16 = vsyncpa [#allocation4], 0  ;;  %s1307_s24 = smov [#allocation5]   ;;  %s1121_s28 = scalar_lea.hbm %s1556_s1, 16384 }
   0x5   :  { %s34_s25 = sshll.u32 %s1307_s24, 4  ;;  %p1122_p0 = scmp.ne.s32.totalorder %s1556_s1, %s1121_s28  ;;  %s35_s25 = int_to_ptr.vmem [resolvable:$true] %s34_s25 }
   0x6   :  { %p1125_p1 = scmp.lt.u32.totalorder %s1121_s28, %s1556_s1 }
   0x8   :  { %p1127_p2 = pnand %p1125_p1, %p1122_p0 }
   0xa   :  { %1130 = shalt.err (!%p1127_p2)
}
   0xb   :  { %s1131_s10 = scalar_lea.vmem %s35_s25, 16384  ;;  %p1136_p4 = scmp.lt.s32.totalorder %s35_s25, %s35_s25 }
   0xc   :  { %p1132_p3 = scmp.ne.s32.totalorder %s35_s25, %s1131_s10  ;;  %p1137_p5 = scmp.lt.s32.totalorder %s1131_s10, %s1131_s10 }
   0xe   :  { %p1138_p6 = por %p1137_p5, %p1136_p4 }
  0x10   :  { %p1139_p7 = pnand %p1138_p6, %p1132_p3 }
  0x12   :  { %1142 = shalt.err (!%p1139_p7)
}
  0x13   :  { %s1308_s11 = smov 512   ;;  %s1309_s12 = smov 32  }
  0x14   :  { %40 = dma.hbm_to_vmem [thread:$0]  %s1556_s1, 16384, %s35_s25, [#allocation6], %s1308_s11, %s1308_s11, %s1309_s12  }
  0x15   :  { %s1310_s15 = smov [#allocation8]   ;;  %s1311_s17 = smov [#allocation11]  }
  0x16   :  { %s57_s16 = sshll.u32 %s1310_s15, 4  ;;  %s76_s18 = sshll.u32 %s1311_s17, 4  ;;  %s58_s16 = int_to_ptr.vmem [resolvable:$true] %s57_s16  ;;  %s77_s18 = int_to_ptr.vmem [resolvable:$true] %s76_s18 }
  0x17   :  { %s1143_s21 = scalar_lea.hbm %s1558_s3, 64 }
  0x18   :  { %p1144_p8 = scmp.ne.s32.totalorder %s1558_s3, %s1143_s21  ;;  %p1147_p9 = scmp.lt.u32.totalorder %s1143_s21, %s1558_s3 }
  0x1a   :  { %p1149_p10 = pnand %p1147_p9, %p1144_p8 }
  0x1c   :  { %1152 = shalt.err (!%p1149_p10)
}
  0x1d   :  { %s1153_s1 = scalar_lea.vmem %s58_s16, 64  ;;  %p1158_p12 = scmp.lt.s32.totalorder %s58_s16, %s58_s16 }
  0x1e   :  { %p1154_p11 = scmp.ne.s32.totalorder %s58_s16, %s1153_s1  ;;  %p1159_p13 = scmp.lt.s32.totalorder %s1153_s1, %s1153_s1 }
  0x20   :  { %p1160_p0 = por %p1159_p13, %p1158_p12 }
  0x22   :  { %p1161_p1 = pnand %p1160_p0, %p1154_p11 }
  0x24   :  { %1164 = shalt.err (!%p1161_p1)
}
  0x25   :  { %60 = dma.hbm_to_vmem [thread:$0]  %s1558_s3, 64, %s58_s16, [#allocation9]  }
  0x26   :  { %s1165_s30 = scalar_lea.hbm %s1560_s5, 8192 }
  0x27   :  { %p1166_p2 = scmp.ne.s32.totalorder %s1560_s5, %s1165_s30  ;;  %p1169_p3 = scmp.lt.u32.totalorder %s1165_s30, %s1560_s5 }
  0x29   :  { %p1171_p4 = pnand %p1169_p3, %p1166_p2 }
  0x2b   :  { %1174 = shalt.err (!%p1171_p4)
}
  0x2c   :  { %s1175_s12 = scalar_lea.vmem %s77_s18, 8192  ;;  %p1180_p6 = scmp.lt.s32.totalorder %s77_s18, %s77_s18 }
  0x2d   :  { %p1176_p5 = scmp.ne.s32.totalorder %s77_s18, %s1175_s12  ;;  %p1181_p7 = scmp.lt.s32.totalorder %s1175_s12, %s1175_s12 }
  0x2f   :  { %p1182_p8 = por %p1181_p7, %p1180_p6 }
  0x31   :  { %p1183_p9 = pnand %p1182_p8, %p1176_p5 }
  0x33   :  { %1186 = shalt.err (!%p1183_p9)
}
  0x34   :  { %s1312_s3 = smov 128   ;;  %s1313_s13 = smov 8  }
  0x35   :  { %82 = dma.hbm_to_vmem [thread:$0]  %s1560_s5, 8192, %s77_s18, [#allocation12], %s1312_s3, %s1312_s3, %s1313_s13  }
  0x36   :  { %s1314_s16 = smov [#allocation2]   ;;  %s1187_s21 = scalar_lea.hbm %s1555_s0, 512 }
  0x37   :  { %s22_s17 = sshll.u32 %s1314_s16, 4  ;;  %p1188_p10 = scmp.ne.s32.totalorder %s1555_s0, %s1187_s21  ;;  %s23_s17 = int_to_ptr.vmem [resolvable:$true] %s22_s17 }
  0x38   :  { %p1191_p11 = scmp.lt.u32.totalorder %s1187_s21, %s1555_s0 }
  0x3a   :  { %p1193_p12 = pnand %p1191_p11, %p1188_p10 }
  0x3c   :  { %1196 = shalt.err (!%p1193_p12)
}
  0x3d   :  { %s1197_s1 = scalar_lea.vmem %s23_s17, 512  ;;  %p1202_p0 = scmp.lt.s32.totalorder %s23_s17, %s23_s17 }
  0x3e   :  { %p1198_p13 = scmp.ne.s32.totalorder %s23_s17, %s1197_s1  ;;  %p1203_p1 = scmp.lt.s32.totalorder %s1197_s1, %s1197_s1 }
  0x40   :  { %p1204_p2 = por %p1203_p1, %p1202_p0 }
  0x42   :  { %p1205_p3 = pnand %p1204_p2, %p1198_p13 }
  0x44   :  { %1208 = shalt.err (!%p1205_p3)
}
  0x45   :  { %s1315_s5 = smov 256   ;;  %s1316_s18 = smov 16  }
  0x46   :  { %28 = dma.hbm_to_vmem [thread:$0]  %s1555_s0, 512, %s23_s17, [#allocation3], %s1315_s5, %s1315_s5, %s1316_s18  }
  0x47   :  { %s1317_s28 = smov [#allocation7]   ;;  %s1318_s30 = smov [#allocation10]  }
  0x48   :  { %s47_s29 = sshll.u32 %s1317_s28, 4  ;;  %s67_s8 = sshll.u32 %s1318_s30, 4  ;;  %s48_s29 = int_to_ptr.vmem [resolvable:$true] %s47_s29  ;;  %s68_s8 = int_to_ptr.vmem [resolvable:$true] %s67_s8 }
  0x49   :  { %s1209_s11 = scalar_lea.hbm %s1557_s2, 64 }
  0x4a   :  { %p1210_p4 = scmp.ne.s32.totalorder %s1557_s2, %s1209_s11  ;;  %p1213_p5 = scmp.lt.u32.totalorder %s1209_s11, %s1557_s2 }
  0x4c   :  { %p1215_p6 = pnand %p1213_p5, %p1210_p4 }
  0x4e   :  { %1218 = shalt.err (!%p1215_p6)
}
  0x4f   :  { %s1219_s0 = scalar_lea.vmem %s48_s29, 64  ;;  %p1224_p8 = scmp.lt.s32.totalorder %s48_s29, %s48_s29 }
  0x50   :  { %p1220_p7 = scmp.ne.s32.totalorder %s48_s29, %s1219_s0  ;;  %p1225_p9 = scmp.lt.s32.totalorder %s1219_s0, %s1219_s0 }
  0x52   :  { %p1226_p10 = por %p1225_p9, %p1224_p8 }
  0x54   :  { %p1227_p11 = pnand %p1226_p10, %p1220_p7 }
  0x56   :  { %1230 = shalt.err (!%p1227_p11)
}
  0x57   :  { %50 = dma.hbm_to_vmem [thread:$0]  %s1557_s2, 64, %s48_s29, [#allocation6]  }
  0x58   :  { %s1231_s22 = scalar_lea.hbm %s1559_s4, 64 }
  0x59   :  { %p1232_p12 = scmp.ne.s32.totalorder %s1559_s4, %s1231_s22  ;;  %p1235_p13 = scmp.lt.u32.totalorder %s1231_s22, %s1559_s4 }
  0x5b   :  { %p1237_p0 = pnand %p1235_p13, %p1232_p12 }
  0x5d   :  { %1240 = shalt.err (!%p1237_p0)
}
  0x5e   :  { %s1241_s5 = scalar_lea.vmem %s68_s8, 64  ;;  %p1246_p2 = scmp.lt.s32.totalorder %s68_s8, %s68_s8 }
  0x5f   :  { %p1242_p1 = scmp.ne.s32.totalorder %s68_s8, %s1241_s5  ;;  %p1247_p3 = scmp.lt.s32.totalorder %s1241_s5, %s1241_s5 }
  0x61   :  { %p1248_p4 = por %p1247_p3, %p1246_p2 }
  0x63   :  { %p1249_p5 = pnand %p1248_p4, %p1242_p1 }
  0x65   :  { %1252 = shalt.err (!%p1249_p5)
}
  0x66   :  { %70 = dma.hbm_to_vmem [thread:$0]  %s1559_s4, 64, %s68_s8, [#allocation9]  }
  0x67   :  { %s1319_s25 = smov [#allocation13]   ;;  %s1253_s30 = scalar_lea.hbm %s1561_s6, 16 }
  0x68   :  { %s89_s27 = sshll.u32 %s1319_s25, 4  ;;  %p1254_p6 = scmp.ne.s32.totalorder %s1561_s6, %s1253_s30  ;;  %s90_s27 = int_to_ptr.vmem [resolvable:$true] %s89_s27 }
  0x69   :  { %p1257_p7 = scmp.lt.u32.totalorder %s1253_s30, %s1561_s6 }
  0x6b   :  { %p1259_p8 = pnand %p1257_p7, %p1254_p6 }
  0x6d   :  { %1262 = shalt.err (!%p1259_p8)
}
  0x6e   :  { %s1263_s14 = scalar_lea.vmem %s90_s27, 16  ;;  %s1267_s4 = scalar_lea.vmem %s90_s27, 32 }
  0x6f   :  { %p1264_p9 = scmp.ne.s32.totalorder %s90_s27, %s1263_s14  ;;  %p1268_p10 = scmp.lt.s32.totalorder %s90_s27, %s90_s27 }
  0x70   :  { %p1269_p11 = scmp.lt.s32.totalorder %s1267_s4, %s1263_s14 }
  0x72   :  { %p1270_p12 = por %p1269_p11, %p1268_p10 }
  0x74   :  { %p1271_p13 = pnand %p1270_p12, %p1264_p9 }
  0x76   :  { %1274 = shalt.err (!%p1271_p13)
}
  0x77   :  { %92 = dma.hbm_to_vmem [thread:$0]  %s1561_s6, 16, %s90_s27, [#allocation12]  }
  0x78   :  { %1297 = dma.done.wait [#allocation3], 512  }
  0x79   :  { %1298 = vsyncadd [#allocation3], 4294966784 }
  0x7a   :  { %1299 = dma.done.wait [#allocation6], 16448  }
  0x7b   :  { %1300 = vsyncadd [#allocation6], 4294950848 }
  0x7c   :  { %1301 = dma.done.wait [#allocation9], 128  }
  0x7d   :  { %1302 = vsyncadd [#allocation9], 4294967168 }
  0x7e   :  { %1303 = dma.done.wait [#allocation12], 8208  }
  0x7f   :  { %1304 = vsyncadd [#allocation12], 4294959088  ;;  %v119_v0 = vld [vmem:[#allocation5 + $0x8] sm:$0xff]  ;;  %v121_v2 = vld [vmem:[#allocation5 + $0x18] sm:$0xff]  ;;  %s1320_s6 = smov [#allocation14]  }
  0x80   :  { %v123_v1 = vld [vmem:[#allocation5 + $0x28] sm:$0xff]  ;;  %v125_v4 = vld [vmem:[#allocation5 + $0x38] sm:$0xff]  ;;  %v118_v5 = vld [vmem:[#allocation5] sm:$0xff]  ;;  %s803_s16 = sshll.u32 %s1320_s6, 4  ;;  %s804_s16 = int_to_ptr.vmem [resolvable:$true] %s803_s16 }
  0x81   :  { %v895_v3 = vpack.c.bf16 %v123_v1, %v119_v0  ;;  %v122_v6 = vld [vmem:[#allocation5 + $0x20] sm:$0xff]  ;;  %v959_v7 = vpack.c.bf16 %v125_v4, %v121_v2  ;;  %v120_v9 = vld [vmem:[#allocation5 + $0x10] sm:$0xff]  ;;  %v127_v11 = vld [vmem:[#allocation5 + $0x48] sm:$0xff]  ;;  %s1275_s0 = scalar_lea.vmem %s804_s16, 256  ;;  %p1280_p1 = scmp.lt.s32.totalorder %s804_s16, %s804_s16 }
  0x82   :  { %v897_v8 = vpack.c.bf16 %v122_v6, %v118_v5  ;;  %v124_v10 = vld [vmem:[#allocation5 + $0x30] sm:$0xff]  ;;  %v131_v13 = vld [vmem:[#allocation5 + $0x68] sm:$0xff]  ;;  %v129_v14 = vld [vmem:[#allocation5 + $0x58] sm:$0xff]  ;;  %p1276_p0 = scmp.ne.s32.totalorder %s804_s16, %s1275_s0  ;;  %p1281_p2 = scmp.lt.s32.totalorder %s1275_s0, %s1275_s0 }
  0x83   :  { %896 = vmatprep.subr.bf16.mxu0 %v895_v3  ;;  %v961_v12 = vpack.c.bf16 %v124_v10, %v120_v9  ;;  %v133_v15 = vld [vmem:[#allocation5 + $0x78] sm:$0xff]  ;;  %960 = vmatprep.subr.bf16.mxu1 %v959_v7  ;;  %v899_v16 = vpack.c.bf16 %v131_v13, %v127_v11  ;;  %v126_v18 = vld [vmem:[#allocation5 + $0x40] sm:$0xff]  ;;  %v128_v20 = vld [vmem:[#allocation5 + $0x50] sm:$0xff] }
  0x84   :  { %898 = vmatpush1.bf16.msra.mxu0 %v897_v8  ;;  %v963_v17 = vpack.c.bf16 %v133_v15, %v129_v14  ;;  %v130_v19 = vld [vmem:[#allocation5 + $0x60] sm:$0xff]  ;;  %v132_v22 = vld [vmem:[#allocation5 + $0x70] sm:$0xff]  ;;  %v135_v23 = vld [vmem:[#allocation5 + $0x88] sm:$0xff]  ;;  %p1282_p3 = por %p1281_p2, %p1280_p1 }
  0x85   :  { %962 = vmatpush1.bf16.msra.mxu1 %v961_v12  ;;  %v901_v21 = vpack.c.bf16 %v130_v19, %v126_v18  ;;  %v139_v24 = vld [vmem:[#allocation5 + $0xa8] sm:$0xff]  ;;  %900 = vmatprep.subr.bf16.mxu0 %v899_v16  ;;  %v965_v25 = vpack.c.bf16 %v132_v22, %v128_v20  ;;  %v137_v27 = vld [vmem:[#allocation5 + $0x98] sm:$0xff]  ;;  %v134_v29 = vld [vmem:[#allocation5 + $0x80] sm:$0xff] }
  0x86   :  { %964 = vmatprep.subr.bf16.mxu1 %v963_v17  ;;  %v903_v26 = vpack.c.bf16 %v139_v24, %v135_v23  ;;  %v141_v28 = vld [vmem:[#allocation5 + $0xb8] sm:$0xff]  ;;  %v138_v31 = vld [vmem:[#allocation5 + $0xa0] sm:$0xff]  ;;  %v136_v32 = vld [vmem:[#allocation5 + $0x90] sm:$0xff]  ;;  %p1283_p4 = pnand %p1282_p3, %p1276_p0 }
  0x87   :  { %v967_v30 = vpack.c.bf16 %v141_v28, %v137_v27  ;;  %v140_v33 = vld [vmem:[#allocation5 + $0xb0] sm:$0xff]  ;;  %v905_v34 = vpack.c.bf16 %v138_v31, %v134_v29  ;;  %v143_v35 = vld [vmem:[#allocation5 + $0xc8] sm:$0xff]  ;;  %v145_v37 = vld [vmem:[#allocation5 + $0xd8] sm:$0xff] }
  0x88   :  { %902 = vmatpush1.bf16.msra.mxu0 %v901_v21  ;;  %v147_v36 = vld [vmem:[#allocation5 + $0xe8] sm:$0xff]  ;;  %v969_v38 = vpack.c.bf16 %v140_v33, %v136_v32  ;;  %v149_v40 = vld [vmem:[#allocation5 + $0xf8] sm:$0xff]  ;;  %v142_v41 = vld [vmem:[#allocation5 + $0xc0] sm:$0xff] }
  0x89   :  { %966 = vmatpush1.bf16.msra.mxu1 %v965_v25  ;;  %904 = vmatprep.subr.bf16.mxu0 %v903_v26  ;;  %v907_v39 = vpack.c.bf16 %v147_v36, %v143_v35  ;;  %v146_v42 = vld [vmem:[#allocation5 + $0xe0] sm:$0xff]  ;;  %v971_v43 = vpack.c.bf16 %v149_v40, %v145_v37  ;;  %v144_v44 = vld [vmem:[#allocation5 + $0xd0] sm:$0xff]  ;;  %v151_v46 = vld [vmem:[#allocation5 + $0x108] sm:$0xff] }
  0x8a   :  { %968 = vmatprep.subr.bf16.mxu1 %v967_v30  ;;  %v148_v45 = vld [vmem:[#allocation5 + $0xf0] sm:$0xff]  ;;  %v155_v47 = vld [vmem:[#allocation5 + $0x128] sm:$0xff]  ;;  %v153_v48 = vld [vmem:[#allocation5 + $0x118] sm:$0xff]  ;;  %v909_v50 = vpack.c.bf16 %v146_v42, %v142_v41 }
  0x8b   :  { %v157_v49 = vld [vmem:[#allocation5 + $0x138] sm:$0xff]  ;;  %v973_v51 = vpack.c.bf16 %v148_v45, %v144_v44  ;;  %v911_v52 = vpack.c.bf16 %v155_v47, %v151_v46  ;;  %v150_v53 = vld [vmem:[#allocation5 + $0x100] sm:$0xff]  ;;  %v152_v55 = vld [vmem:[#allocation5 + $0x110] sm:$0xff] }
  0x8c   :  { %906 = vmatpush1.bf16.msra.mxu0 %v905_v34  ;;  %v154_v54 = vld [vmem:[#allocation5 + $0x120] sm:$0xff]  ;;  %v975_v56 = vpack.c.bf16 %v157_v49, %v153_v48  ;;  %v156_v57 = vld [vmem:[#allocation5 + $0x130] sm:$0xff]  ;;  %v159_v58 = vld [vmem:[#allocation5 + $0x148] sm:$0xff] }
  0x8d   :  { %970 = vmatpush1.bf16.msra.mxu1 %v969_v38  ;;  %908 = vmatprep.subr.bf16.mxu0 %v907_v39  ;;  %v163_v59 = vld [vmem:[#allocation5 + $0x168] sm:$0xff]  ;;  %v161_v60 = vld [vmem:[#allocation5 + $0x158] sm:$0xff]  ;;  %v913_v62 = vpack.c.bf16 %v154_v54, %v150_v53  ;;  %v977_v63 = vpack.c.bf16 %v156_v57, %v152_v55  ;;  %v158_v1 = vld [vmem:[#allocation5 + $0x140] sm:$0xff] }
  0x8e   :  { %972 = vmatprep.subr.bf16.mxu1 %v971_v43  ;;  %v165_v61 = vld [vmem:[#allocation5 + $0x178] sm:$0xff]  ;;  %v915_v0 = vpack.c.bf16 %v163_v59, %v159_v58  ;;  %v162_v2 = vld [vmem:[#allocation5 + $0x160] sm:$0xff]  ;;  %v160_v3 = vld [vmem:[#allocation5 + $0x150] sm:$0xff] }
  0x8f   :  { %v979_v4 = vpack.c.bf16 %v165_v61, %v161_v60  ;;  %v164_v5 = vld [vmem:[#allocation5 + $0x170] sm:$0xff]  ;;  %v167_v6 = vld [vmem:[#allocation5 + $0x188] sm:$0xff]  ;;  %v169_v8 = vld [vmem:[#allocation5 + $0x198] sm:$0xff]  ;;  %v917_v10 = vpack.c.bf16 %v162_v2, %v158_v1 }
  0x90   :  { %910 = vmatpush1.bf16.msra.mxu0 %v909_v50  ;;  %v171_v7 = vld [vmem:[#allocation5 + $0x1a8] sm:$0xff]  ;;  %v173_v9 = vld [vmem:[#allocation5 + $0x1b8] sm:$0xff]  ;;  %v981_v11 = vpack.c.bf16 %v164_v5, %v160_v3  ;;  %v166_v13 = vld [vmem:[#allocation5 + $0x180] sm:$0xff] }
  0x91   :  { %974 = vmatpush1.bf16.msra.mxu1 %v973_v51  ;;  %912 = vmatprep.subr.bf16.mxu0 %v911_v52  ;;  %v919_v12 = vpack.c.bf16 %v171_v7, %v167_v6  ;;  %v170_v14 = vld [vmem:[#allocation5 + $0x1a0] sm:$0xff]  ;;  %v168_v15 = vld [vmem:[#allocation5 + $0x190] sm:$0xff]  ;;  %v983_v16 = vpack.c.bf16 %v173_v9, %v169_v8  ;;  %v175_v18 = vld [vmem:[#allocation5 + $0x1c8] sm:$0xff] }
  0x92   :  { %976 = vmatprep.subr.bf16.mxu1 %v975_v56  ;;  %v172_v17 = vld [vmem:[#allocation5 + $0x1b0] sm:$0xff]  ;;  %v179_v19 = vld [vmem:[#allocation5 + $0x1e8] sm:$0xff]  ;;  %v177_v20 = vld [vmem:[#allocation5 + $0x1d8] sm:$0xff]  ;;  %v921_v22 = vpack.c.bf16 %v170_v14, %v166_v13 }
  0x93   :  { %v181_v21 = vld [vmem:[#allocation5 + $0x1f8] sm:$0xff]  ;;  %v985_v23 = vpack.c.bf16 %v172_v17, %v168_v15  ;;  %v923_v24 = vpack.c.bf16 %v179_v19, %v175_v18  ;;  %v174_v25 = vld [vmem:[#allocation5 + $0x1c0] sm:$0xff]  ;;  %v176_v27 = vld [vmem:[#allocation5 + $0x1d0] sm:$0xff] }
  0x94   :  { %914 = vmatpush1.bf16.msra.mxu0 %v913_v62  ;;  %v178_v26 = vld [vmem:[#allocation5 + $0x1e0] sm:$0xff]  ;;  %v987_v28 = vpack.c.bf16 %v181_v21, %v177_v20  ;;  %v180_v29 = vld [vmem:[#allocation5 + $0x1f0] sm:$0xff]  ;;  %v183_v30 = vld [vmem:[#allocation5 + $0x208] sm:$0xff] }
  0x95   :  { %978 = vmatpush1.bf16.msra.mxu1 %v977_v63  ;;  %916 = vmatprep.subr.bf16.mxu0 %v915_v0  ;;  %v187_v31 = vld [vmem:[#allocation5 + $0x228] sm:$0xff]  ;;  %v185_v32 = vld [vmem:[#allocation5 + $0x218] sm:$0xff]  ;;  %v925_v34 = vpack.c.bf16 %v178_v26, %v174_v25  ;;  %v989_v35 = vpack.c.bf16 %v180_v29, %v176_v27  ;;  %v182_v37 = vld [vmem:[#allocation5 + $0x200] sm:$0xff] }
  0x96   :  { %980 = vmatprep.subr.bf16.mxu1 %v979_v4  ;;  %v189_v33 = vld [vmem:[#allocation5 + $0x238] sm:$0xff]  ;;  %v927_v36 = vpack.c.bf16 %v187_v31, %v183_v30  ;;  %v186_v38 = vld [vmem:[#allocation5 + $0x220] sm:$0xff]  ;;  %v184_v39 = vld [vmem:[#allocation5 + $0x210] sm:$0xff] }
  0x97   :  { %v991_v40 = vpack.c.bf16 %v189_v33, %v185_v32  ;;  %v188_v41 = vld [vmem:[#allocation5 + $0x230] sm:$0xff]  ;;  %v191_v42 = vld [vmem:[#allocation5 + $0x248] sm:$0xff]  ;;  %v193_v44 = vld [vmem:[#allocation5 + $0x258] sm:$0xff]  ;;  %v929_v46 = vpack.c.bf16 %v186_v38, %v182_v37 }
  0x98   :  { %918 = vmatpush1.bf16.msra.mxu0 %v917_v10  ;;  %v195_v43 = vld [vmem:[#allocation5 + $0x268] sm:$0xff]  ;;  %v197_v45 = vld [vmem:[#allocation5 + $0x278] sm:$0xff]  ;;  %v993_v47 = vpack.c.bf16 %v188_v41, %v184_v39  ;;  %v190_v49 = vld [vmem:[#allocation5 + $0x240] sm:$0xff] }
  0x99   :  { %982 = vmatpush1.bf16.msra.mxu1 %v981_v11  ;;  %920 = vmatprep.subr.bf16.mxu0 %v919_v12  ;;  %v931_v48 = vpack.c.bf16 %v195_v43, %v191_v42  ;;  %v194_v50 = vld [vmem:[#allocation5 + $0x260] sm:$0xff]  ;;  %v192_v51 = vld [vmem:[#allocation5 + $0x250] sm:$0xff]  ;;  %v995_v52 = vpack.c.bf16 %v197_v45, %v193_v44  ;;  %v199_v54 = vld [vmem:[#allocation5 + $0x288] sm:$0xff] }
  0x9a   :  { %984 = vmatprep.subr.bf16.mxu1 %v983_v16  ;;  %v196_v53 = vld [vmem:[#allocation5 + $0x270] sm:$0xff]  ;;  %v203_v55 = vld [vmem:[#allocation5 + $0x2a8] sm:$0xff]  ;;  %v201_v56 = vld [vmem:[#allocation5 + $0x298] sm:$0xff]  ;;  %v933_v58 = vpack.c.bf16 %v194_v50, %v190_v49 }
  0x9b   :  { %v205_v57 = vld [vmem:[#allocation5 + $0x2b8] sm:$0xff]  ;;  %v997_v59 = vpack.c.bf16 %v196_v53, %v192_v51  ;;  %v935_v60 = vpack.c.bf16 %v203_v55, %v199_v54  ;;  %v198_v61 = vld [vmem:[#allocation5 + $0x280] sm:$0xff]  ;;  %v200_v63 = vld [vmem:[#allocation5 + $0x290] sm:$0xff] }
  0x9c   :  { %922 = vmatpush1.bf16.msra.mxu0 %v921_v22  ;;  %v202_v62 = vld [vmem:[#allocation5 + $0x2a0] sm:$0xff]  ;;  %v999_v0 = vpack.c.bf16 %v205_v57, %v201_v56  ;;  %v204_v1 = vld [vmem:[#allocation5 + $0x2b0] sm:$0xff]  ;;  %v207_v2 = vld [vmem:[#allocation5 + $0x2c8] sm:$0xff] }
  0x9d   :  { %986 = vmatpush1.bf16.msra.mxu1 %v985_v23  ;;  %924 = vmatprep.subr.bf16.mxu0 %v923_v24  ;;  %v211_v3 = vld [vmem:[#allocation5 + $0x2e8] sm:$0xff]  ;;  %v209_v4 = vld [vmem:[#allocation5 + $0x2d8] sm:$0xff]  ;;  %v937_v6 = vpack.c.bf16 %v202_v62, %v198_v61  ;;  %v206_v7 = vld [vmem:[#allocation5 + $0x2c0] sm:$0xff]  ;;  %v1001_v8 = vpack.c.bf16 %v204_v1, %v200_v63 }
  0x9e   :  { %988 = vmatprep.subr.bf16.mxu1 %v987_v28  ;;  %v213_v5 = vld [vmem:[#allocation5 + $0x2f8] sm:$0xff]  ;;  %v939_v9 = vpack.c.bf16 %v211_v3, %v207_v2  ;;  %v210_v10 = vld [vmem:[#allocation5 + $0x2e0] sm:$0xff]  ;;  %v208_v11 = vld [vmem:[#allocation5 + $0x2d0] sm:$0xff] }
  0x9f   :  { %v212_v12 = vld [vmem:[#allocation5 + $0x2f0] sm:$0xff]  ;;  %v1003_v13 = vpack.c.bf16 %v213_v5, %v209_v4  ;;  %v215_v14 = vld [vmem:[#allocation5 + $0x308] sm:$0xff]  ;;  %v217_v17 = vld [vmem:[#allocation5 + $0x318] sm:$0xff]  ;;  %v941_v19 = vpack.c.bf16 %v210_v10, %v206_v7  ;;  %v248_v4 = vlaneseq }
  0xa0   :  { %926 = vmatpush1.bf16.msra.mxu0 %v925_v34  ;;  %v219_v15 = vld [vmem:[#allocation5 + $0x328] sm:$0xff]  ;;  %v221_v18 = vld [vmem:[#allocation5 + $0x338] sm:$0xff]  ;;  %v1005_v20 = vpack.c.bf16 %v212_v12, %v208_v11  ;;  %v214_v22 = vld [vmem:[#allocation5 + $0x300] sm:$0xff] }
  0xa1   :  { %990 = vmatpush1.bf16.msra.mxu1 %v989_v35  ;;  %928 = vmatprep.subr.bf16.mxu0 %v927_v36  ;;  %v115_v16 = vld [vmem:[#allocation2 + $0x8] sm:$0xff]  ;;  %v943_v21 = vpack.c.bf16 %v219_v15, %v215_v14  ;;  %v218_v23 = vld [vmem:[#allocation5 + $0x320] sm:$0xff]  ;;  %v216_v24 = vld [vmem:[#allocation5 + $0x310] sm:$0xff]  ;;  %v1007_v25 = vpack.c.bf16 %v221_v18, %v217_v17  ;;  %v249_v5 = vshrl.u32 %v248_v4, 7 }
  0xa2   :  { %992 = vmatprep.subr.bf16.mxu1 %v991_v40  ;;  %332 = vmatprep.mubr.f32.mxu0 %v115_v16  ;;  %v220_v26 = vld [vmem:[#allocation5 + $0x330] sm:$0xff]  ;;  %v223_v27 = vld [vmem:[#allocation5 + $0x348] sm:$0xff]  ;;  %v225_v29 = vld [vmem:[#allocation5 + $0x358] sm:$0xff]  ;;  %v945_v31 = vpack.c.bf16 %v218_v23, %v214_v22 }
  0xa3   :  { %409 = vmatprep.mubr.f32.mxu1 %v115_v16  ;;  %v227_v28 = vld [vmem:[#allocation5 + $0x368] sm:$0xff]  ;;  %v229_v30 = vld [vmem:[#allocation5 + $0x378] sm:$0xff]  ;;  %v1009_v32 = vpack.c.bf16 %v220_v26, %v216_v24  ;;  %v222_v34 = vld [vmem:[#allocation5 + $0x340] sm:$0xff]  ;;  %v1454_v10 = vsub.s32 3, %v249_v5 }
  0xa4   :  { %930 = vmatpush1.bf16.msra.mxu0 %v929_v46  ;;  %v947_v33 = vpack.c.bf16 %v227_v28, %v223_v27  ;;  %v226_v35 = vld [vmem:[#allocation5 + $0x360] sm:$0xff]  ;;  %v224_v36 = vld [vmem:[#allocation5 + $0x350] sm:$0xff]  ;;  %v1011_v37 = vpack.c.bf16 %v229_v30, %v225_v29  ;;  %v231_v39 = vld [vmem:[#allocation5 + $0x388] sm:$0xff] }
  0xa5   :  { %994 = vmatpush1.bf16.msra.mxu1 %v993_v47  ;;  %932 = vmatprep.subr.bf16.mxu0 %v931_v48  ;;  %v228_v38 = vld [vmem:[#allocation5 + $0x370] sm:$0xff]  ;;  %v235_v40 = vld [vmem:[#allocation5 + $0x3a8] sm:$0xff]  ;;  %v233_v41 = vld [vmem:[#allocation5 + $0x398] sm:$0xff]  ;;  %v949_v43 = vpack.c.bf16 %v226_v35, %v222_v34 }
  0xa6   :  { %996 = vmatprep.subr.bf16.mxu1 %v995_v52  ;;  %v237_v42 = vld [vmem:[#allocation5 + $0x3b8] sm:$0xff]  ;;  %v1013_v44 = vpack.c.bf16 %v228_v38, %v224_v36  ;;  %v951_v45 = vpack.c.bf16 %v235_v40, %v231_v39  ;;  %v230_v46 = vld [vmem:[#allocation5 + $0x380] sm:$0xff]  ;;  %v232_v48 = vld [vmem:[#allocation5 + $0x390] sm:$0xff] }
  0xa7   :  { %v234_v47 = vld [vmem:[#allocation5 + $0x3a0] sm:$0xff]  ;;  %v1015_v49 = vpack.c.bf16 %v237_v42, %v233_v41  ;;  %v236_v50 = vld [vmem:[#allocation5 + $0x3b0] sm:$0xff]  ;;  %v239_v51 = vld [vmem:[#allocation5 + $0x3c8] sm:$0xff] }
  0xa8   :  { %934 = vmatpush1.bf16.msra.mxu0 %v933_v58  ;;  %v243_v52 = vld [vmem:[#allocation5 + $0x3e8] sm:$0xff]  ;;  %v241_v53 = vld [vmem:[#allocation5 + $0x3d8] sm:$0xff]  ;;  %v953_v55 = vpack.c.bf16 %v234_v47, %v230_v46  ;;  %v1017_v56 = vpack.c.bf16 %v236_v50, %v232_v48  ;;  %v238_v58 = vld [vmem:[#allocation5 + $0x3c0] sm:$0xff] }
  0xa9   :  { %998 = vmatpush1.bf16.msra.mxu1 %v997_v59  ;;  %936 = vmatprep.subr.bf16.mxu0 %v935_v60  ;;  %v245_v54 = vld [vmem:[#allocation5 + $0x3f8] sm:$0xff]  ;;  %v955_v57 = vpack.c.bf16 %v243_v52, %v239_v51  ;;  %v242_v59 = vld [vmem:[#allocation5 + $0x3e0] sm:$0xff]  ;;  %v240_v61 = vld [vmem:[#allocation5 + $0x3d0] sm:$0xff] }
  0xaa   :  { %1000 = vmatprep.subr.bf16.mxu1 %v999_v0  ;;  %v1019_v60 = vpack.c.bf16 %v245_v54, %v241_v53  ;;  %v244_v62 = vld [vmem:[#allocation5 + $0x3f0] sm:$0xff]  ;;  %v957_v63 = vpack.c.bf16 %v242_v59, %v238_v58  ;;  %v114_v1 = vld [vmem:[#allocation2] sm:$0xff]  ;;  %v117_v2 = vld [vmem:[#allocation2 + $0x18] sm:$0xff] }
  0xab   :  { %v1021_v0 = vpack.c.bf16 %v244_v62, %v240_v61  ;;  %v116_v3 = vld [vmem:[#allocation2 + $0x10] sm:$0xff]  ;;  %v246_v7 = vld [vmem:[#allocation7] sm:$0xf] }
  0xac   :  { %938 = vmatpush1.bf16.msra.mxu0 %v937_v6  ;;  %v1448_v6 = vsub.s32 0, %v249_v5  ;;  %v263_v14 = vrot.slane %v246_v7, %v1454_v10 }
  0xad   :  { %1002 = vmatpush1.bf16.msra.mxu1 %v1001_v8  ;;  %940 = vmatprep.subr.bf16.mxu0 %v939_v9  ;;  %v1450_v8 = vsub.s32 2, %v249_v5  ;;  %v1452_v9 = vsub.s32 1, %v249_v5 }
  0xae   :  { %1004 = vmatprep.subr.bf16.mxu1 %v1003_v13  ;;  %v251_v11 = vrot.slane %v246_v7, %v1448_v6 }
  0xaf   :  { %v259_v12 = vrot.slane %v246_v7, %v1450_v8  ;;  %v255_v13 = vrot.slane %v246_v7, %v1452_v9 }
  0xb0   :  { %942 = vmatpush1.bf16.msra.mxu0 %v941_v19 }
  0xb1   :  { %1006 = vmatpush1.bf16.msra.mxu1 %v1005_v20  ;;  %944 = vmatprep.subr.bf16.mxu0 %v943_v21 }
  0xb2   :  { %1008 = vmatprep.subr.bf16.mxu1 %v1007_v25 }
  0xb4   :  { %946 = vmatpush1.bf16.msra.mxu0 %v945_v31 }
  0xb5   :  { %1010 = vmatpush1.bf16.msra.mxu1 %v1009_v32  ;;  %948 = vmatprep.subr.bf16.mxu0 %v947_v33 }
  0xb6   :  { %1012 = vmatprep.subr.bf16.mxu1 %v1011_v37 }
  0xb8   :  { %950 = vmatpush1.bf16.msra.mxu0 %v949_v43 }
  0xb9   :  { %1014 = vmatpush1.bf16.msra.mxu1 %v1013_v44  ;;  %952 = vmatprep.subr.bf16.mxu0 %v951_v45 }
  0xba   :  { %1016 = vmatprep.subr.bf16.mxu1 %v1015_v49 }
  0xbc   :  { %954 = vmatpush1.bf16.msra.mxu0 %v953_v55 }
  0xbd   :  { %1018 = vmatpush1.bf16.msra.mxu1 %v1017_v56  ;;  %956 = vmatprep.subr.bf16.mxu0 %v955_v57 }
  0xbe   :  { %1020 = vmatprep.subr.bf16.mxu1 %v1019_v60 }
  0xc0   :  { %958 = vmatpush1.bf16.msra.mxu0 %v957_v63 }
  0xc1   :  { %1022 = vmatpush1.bf16.msra.mxu1 %v1021_v0 }
  0xc3   :  { %333 = vmatmul.mubr.f32.vlgmr.msra.gmra.mrb[0].mxu0 %v114_v1 }
  0xc4   :  { %410 = vmatmul.mubr.f32.vlgmr.msra.gmra.mrb[0].mxu1 %v114_v1  ;;  %338 = vmatprep.mubr.f32.mxu0 %v117_v2 }
  0xc5   :  { %415 = vmatprep.mubr.f32.mxu1 %v117_v2 }
  0xc7   :  { %339 = vmatmul.mubr.f32.gmra.mrb[2].mxu0 %v116_v3 }
  0xc8   :  { %416 = vmatmul.mubr.f32.gmra.mrb[2].mxu1 %v116_v3 }
 0x196   :  { %v334_v15 = vpop.f32.mrb[0].mxu0 }
 0x197   :  { %v335_v16 = vadd.f32 %v334_v15, %v251_v11  ;;  %v411_v17 = vpop.f32.mrb[0].mxu1  ;;  %v336_v18 = vpop.f32.mrb[1].mxu0 }
 0x198   :  { %v412_v19 = vadd.f32 %v411_v17, %v259_v12  ;;  %v337_v20 = vadd.f32 %v336_v18, %v255_v13  ;;  %v413_v21 = vpop.f32.mrb[1].mxu1  ;;  %v591_v17 = vld [vmem:[#allocation11 + $0x80] sm:$0xff]  ;;  %v592_v18 = vld [vmem:[#allocation11 + $0x88] sm:$0xff] }
 0x199   :  { %v430_v22 = vmul.f32 0.70710677, %v335_v16  ;;  %v414_v23 = vadd.f32 %v413_v21, %v263_v14  ;;  %v422_v41 = vmul.f32 0.5, %v335_v16  ;;  %v624_v21 = vld [vmem:[#allocation11 + $0x188] sm:$0xff] }
 0x19a   :  { %v432_v24 = vmul.f32 0.70710677, %v412_v19  ;;  %v431_v25 = vmul.f32 0.70710677, %v337_v20  ;;  %v340_v27 = vpop.f32.mrb[2].mxu0  ;;  %v423_v47 = vmul.f32 0.5, %v337_v20  ;;  %v1023_v20 = vpack.c.bf16 %v592_v18, %v591_v17 }
 0x19b   :  { %1101 = verf.f32 %v430_v22  ;;  %v433_v26 = vmul.f32 0.70710677, %v414_v23  ;;  %v417_v28 = vpop.f32.mrb[2].mxu1  ;;  %v341_v29 = vadd.f32 %v340_v27, %v251_v11  ;;  %v342_v31 = vpop.f32.mrb[3].mxu0  ;;  %v424_v50 = vmul.f32 0.5, %v412_v19  ;;  %v623_v19 = vld [vmem:[#allocation11 + $0x180] sm:$0xff] }
 0x19c   :  { %1103 = verf.f32 %v432_v24  ;;  %v418_v30 = vadd.f32 %v417_v28, %v259_v12  ;;  %v419_v32 = vpop.f32.mrb[3].mxu1  ;;  %v343_v33 = vadd.f32 %v342_v31, %v255_v13  ;;  %v425_v57 = vmul.f32 0.5, %v414_v23  ;;  %v575_v22 = vld [vmem:[#allocation11] sm:$0xff]  ;;  %v576_v23 = vld [vmem:[#allocation11 + $0x8] sm:$0xff]  ;;  %v593_v28 = vld [vmem:[#allocation11 + $0x90] sm:$0xff]  ;;  %1024 = vmatprep.subr.bf16.mxu0 %v1023_v20 }
 0x19d   :  { %1105 = verf.f32 %v431_v25  ;;  %v420_v34 = vadd.f32 %v419_v32, %v263_v14  ;;  %v434_v35 = vmul.f32 0.70710677, %v341_v29  ;;  %v426_v54 = vmul.f32 0.5, %v341_v29  ;;  %v608_v27 = vld [vmem:[#allocation11 + $0x108] sm:$0xff]  ;;  %v625_v31 = vld [vmem:[#allocation11 + $0x190] sm:$0xff]  ;;  %v626_v32 = vld [vmem:[#allocation11 + $0x198] sm:$0xff] }
 0x19e   :  { %1107 = verf.f32 %v433_v26  ;;  %v436_v36 = vmul.f32 0.70710677, %v418_v30  ;;  %v435_v37 = vmul.f32 0.70710677, %v343_v33  ;;  %v427_v63 = vmul.f32 0.5, %v343_v33  ;;  %v607_v26 = vld [vmem:[#allocation11 + $0x100] sm:$0xff] }
 0x19f   :  { %1109 = verf.f32 %v434_v35  ;;  %v437_v38 = vmul.f32 0.70710677, %v420_v34  ;;  %v428_v3 = vmul.f32 0.5, %v418_v30  ;;  %v429_v12 = vmul.f32 0.5, %v420_v34  ;;  %v594_v30 = vld [vmem:[#allocation11 + $0x98] sm:$0xff]  ;;  %v577_v35 = vld [vmem:[#allocation11 + $0x10] sm:$0xff] }
 0x1a0   :  { %1111 = verf.f32 %v436_v36  ;;  %v1055_v24 = vpack.c.bf16 %v624_v21, %v623_v19  ;;  %v1025_v25 = vpack.c.bf16 %v576_v23, %v575_v22  ;;  %v1057_v29 = vpack.c.bf16 %v608_v27, %v607_v26  ;;  %v578_v36 = vld [vmem:[#allocation11 + $0x18] sm:$0xff]  ;;  %v629_v21 = vld [vmem:[#allocation11 + $0x1b0] sm:$0xff] }
 0x1a1   :  { %1113 = verf.f32 %v435_v37  ;;  %v1027_v33 = vpack.c.bf16 %v594_v30, %v593_v28  ;;  %v1059_v34 = vpack.c.bf16 %v626_v32, %v625_v31  ;;  %v609_v37 = vld [vmem:[#allocation11 + $0x110] sm:$0xff]  ;;  %v598_v20 = vld [vmem:[#allocation11 + $0xb8] sm:$0xff]  ;;  %v599_v31 = vld [vmem:[#allocation11 + $0xc0] sm:$0xff] }
 0x1a2   :  { %1115 = verf.f32 %v437_v38  ;;  %1056 = vmatprep.subr.bf16.mxu1 %v1055_v24  ;;  %1026 = vmatpush3.bf16.msra.mxu0 %v1025_v25  ;;  %v1029_v38 = vpack.c.bf16 %v578_v36, %v577_v35  ;;  %v630_v23 = vld [vmem:[#allocation11 + $0x1b8] sm:$0xff]  ;;  %v581_v24 = vld [vmem:[#allocation11 + $0x30] sm:$0xff]  ;;  %v600_v32 = vld [vmem:[#allocation11 + $0xc8] sm:$0xff] }
 0x1a3   :  { %1058 = vmatpush3.bf16.msra.mxu1 %v1057_v29  ;;  %1028 = vmatprep.subr.bf16.mxu0 %v1027_v33  ;;  %v582_v25 = vld [vmem:[#allocation11 + $0x38] sm:$0xff]  ;;  %v1067_v26 = vpack.c.bf16 %v630_v23, %v629_v21  ;;  %v613_v28 = vld [vmem:[#allocation11 + $0x130] sm:$0xff]  ;;  %v631_v33 = vld [vmem:[#allocation11 + $0x1c0] sm:$0xff] }
 0x1a4   :  { %1060 = vmatprep.subr.bf16.mxu1 %v1059_v34  ;;  %v1037_v27 = vpack.c.bf16 %v582_v25, %v581_v24  ;;  %v614_v29 = vld [vmem:[#allocation11 + $0x138] sm:$0xff]  ;;  %v1039_v34 = vpack.c.bf16 %v600_v32, %v599_v31  ;;  %v632_v35 = vld [vmem:[#allocation11 + $0x1c8] sm:$0xff]  ;;  %v583_v36 = vld [vmem:[#allocation11 + $0x40] sm:$0xff] }
 0x1a5   :  { %v1102_v39 = vpop.eup %1101  ;;  %v1069_v30 = vpack.c.bf16 %v614_v29, %v613_v28  ;;  %v621_v23 = vld [vmem:[#allocation11 + $0x170] sm:$0xff]  ;;  %v622_v24 = vld [vmem:[#allocation11 + $0x178] sm:$0xff] }
 0x1a6   :  { %v1104_v40 = vpop.eup %1103  ;;  %v446_v42 = vadd.f32 1.0, %v1102_v39  ;;  %v610_v39 = vld [vmem:[#allocation11 + $0x118] sm:$0xff]  ;;  %1030 = vmatpush3.bf16.msra.mxu0 %v1029_v38  ;;  %v1071_v38 = vpack.c.bf16 %v632_v35, %v631_v33 }
 0x1a7   :  { %v1106_v43 = vpop.eup %1105  ;;  %v448_v46 = vadd.f32 1.0, %v1104_v40  ;;  %v595_v40 = vld [vmem:[#allocation11 + $0xa0] sm:$0xff]  ;;  %v515_v33 = vld [vmem:[#allocation8] sm:$0xf] }
 0x1a8   :  { %v1108_v44 = vpop.eup %1107  ;;  %v1460_v45 = vmul.f32 %v446_v42, %v422_v41  ;;  %v447_v48 = vadd.f32 1.0, %v1106_v43  ;;  %v596_v41 = vld [vmem:[#allocation11 + $0xa8] sm:$0xff]  ;;  %v1061_v42 = vpack.c.bf16 %v610_v39, %v609_v37  ;;  %v520_v35 = vrot.slane %v515_v33, %v1448_v6 }
 0x1a9   :  { %v1110_v49 = vpop.eup %1109  ;;  %v449_v52 = vadd.f32 1.0, %v1108_v44  ;;  %v1464_v58 = vmul.f32 %v448_v46, %v424_v50  ;;  %v1031_v43 = vpack.c.bf16 %v596_v41, %v595_v40  ;;  %v627_v44 = vld [vmem:[#allocation11 + $0x1a0] sm:$0xff]  ;;  %v628_v46 = vld [vmem:[#allocation11 + $0x1a8] sm:$0xff] }
 0x1aa   :  { %v1462_v51 = vmul.f32 %v447_v48, %v423_v47  ;;  %v1112_v53 = vpop.eup %1111  ;;  %v450_v55 = vadd.f32 1.0, %v1110_v49  ;;  %v579_v47 = vld [vmem:[#allocation11 + $0x20] sm:$0xff]  ;;  %v1063_v48 = vpack.c.bf16 %v628_v46, %v627_v44  ;;  %v580_v49 = vld [vmem:[#allocation11 + $0x28] sm:$0xff]  ;;  %1062 = vmatpush3.bf16.msra.mxu1 %v1061_v42  ;;  %v602_v44 = vld [vmem:[#allocation11 + $0xd8] sm:$0xff] }
 0x1ab   :  { %v1114_v56 = vpop.eup %1113  ;;  %v452_v62 = vadd.f32 1.0, %v1112_v53  ;;  %v1470_v1 = vmul.f32 %v449_v52, %v425_v57  ;;  %v611_v50 = vld [vmem:[#allocation11 + $0x120] sm:$0xff]  ;;  %v612_v52 = vld [vmem:[#allocation11 + $0x128] sm:$0xff]  ;;  %v1033_v53 = vpack.c.bf16 %v580_v49, %v579_v47  ;;  %1032 = vmatprep.subr.bf16.mxu0 %v1031_v43  ;;  %v601_v43 = vld [vmem:[#allocation11 + $0xd0] sm:$0xff] }
 0x1ac   :  { %v462_v59 = vadd.f32 %v1462_v51, %v1460_v45  ;;  %v1116_v60 = vpop.eup %1115  ;;  %v1468_v61 = vmul.f32 %v450_v55, %v426_v54  ;;  %v451_v0 = vadd.f32 1.0, %v1114_v56  ;;  %v1065_v54 = vpack.c.bf16 %v612_v52, %v611_v50  ;;  %1064 = vmatprep.subr.bf16.mxu1 %v1063_v48  ;;  %v584_v37 = vld [vmem:[#allocation11 + $0x48] sm:$0xff]  ;;  %v615_v40 = vld [vmem:[#allocation11 + $0x140] sm:$0xff]  ;;  %v633_v46 = vld [vmem:[#allocation11 + $0x1d0] sm:$0xff] }
 0x1ad   :  { %v453_v5 = vadd.f32 1.0, %v1116_v60  ;;  %v1476_v11 = vmul.f32 %v452_v62, %v428_v3  ;;  %1034 = vmatpush3.bf16.msra.mxu0 %v1033_v53  ;;  %v1041_v39 = vpack.c.bf16 %v584_v37, %v583_v36  ;;  %v616_v41 = vld [vmem:[#allocation11 + $0x148] sm:$0xff]  ;;  %v1043_v47 = vpack.c.bf16 %v602_v44, %v601_v43  ;;  %v634_v48 = vld [vmem:[#allocation11 + $0x1d8] sm:$0xff]  ;;  %v585_v49 = vld [vmem:[#allocation11 + $0x50] sm:$0xff] }
 0x1ae   :  { %v463_v2 = vadd.f32 %v462_v59, %v1464_v58  ;;  %v1473_v4 = vmul.f32 %v451_v0, %v427_v63  ;;  %1066 = vmatpush3.bf16.msra.mxu1 %v1065_v54  ;;  %v1073_v42 = vpack.c.bf16 %v616_v41, %v615_v40  ;;  %v586_v50 = vld [vmem:[#allocation11 + $0x58] sm:$0xff]  ;;  %v1075_v52 = vpack.c.bf16 %v634_v48, %v633_v46  ;;  %v617_v54 = vld [vmem:[#allocation11 + $0x150] sm:$0xff] }
 0x1af   :  { %v1480_v14 = vmul.f32 %v453_v5, %v429_v12  ;;  %1068 = vmatprep.subr.bf16.mxu1 %v1067_v26  ;;  %v1045_v53 = vpack.c.bf16 %v586_v50, %v585_v49  ;;  %v1085_v26 = vpack.c.bf16 %v622_v24, %v621_v23  ;;  %v528_v36 = vrot.slane %v515_v33, %v1450_v8 }
 0x1b0   :  { %v464_v7 = vadd.f32 %v463_v2, %v1470_v1  ;;  %v467_v13 = vadd.f32 %v1473_v4, %v1468_v61  ;;  %v524_v37 = vrot.slane %v515_v33, %v1452_v9 }
 0x1b2   :  { %465 = vadd.xlane.f32.xlu0 %v464_v7  ;;  %v468_v15 = vadd.f32 %v467_v13, %v1476_v11  ;;  %1070 = vmatpush3.bf16.msra.mxu1 %v1069_v30 }
 0x1b3   :  { %1072 = vmatprep.subr.bf16.mxu1 %v1071_v38  ;;  %v532_v38 = vrot.slane %v515_v33, %v1454_v10 }
 0x1b4   :  { %v469_v16 = vadd.f32 %v468_v15, %v1480_v14 }
 0x1b6   :  { %470 = vadd.xlane.f32.xlu0 %v469_v16  ;;  %1074 = vmatpush3.bf16.msra.mxu1 %v1073_v42 }
 0x1b7   :  { %1076 = vmatprep.subr.bf16.mxu1 %v1075_v52 }
 0x23f   :  { %v466_v55 = vpop.xlane.xlu0 %465 }
 0x240   :  { %v473_v56 = vmul.f32 0.001953125, %v466_v55  ;;  %v618_v55 = vld [vmem:[#allocation11 + $0x158] sm:$0xff] }
 0x242   :  { %v1485_v57 = vsub.f32 %v1460_v45, %v473_v56  ;;  %v1488_v59 = vsub.f32 %v1462_v51, %v473_v56  ;;  %v1491_v60 = vsub.f32 %v1464_v58, %v473_v56  ;;  %v1494_v63 = vsub.f32 %v1470_v1, %v473_v56  ;;  %v603_v56 = vld [vmem:[#allocation11 + $0xe0] sm:$0xff] }
 0x243   :  { %v471_v62 = vpop.xlane.xlu0 %470 }
 0x244   :  { %v483_v0 = vmul.f32 %v1485_v57, %v1485_v57  ;;  %v484_v2 = vmul.f32 %v1488_v59, %v1488_v59  ;;  %v474_v3 = vmul.f32 0.001953125, %v471_v62  ;;  %v485_v45 = vmul.f32 %v1491_v60, %v1491_v60 }
 0x245   :  { %v486_v7 = vmul.f32 %v1494_v63, %v1494_v63  ;;  %v1077_v62 = vpack.c.bf16 %v618_v55, %v617_v54 }
 0x246   :  { %v491_v5 = vadd.f32 %v484_v2, %v483_v0  ;;  %v1503_v51 = vsub.f32 %v1468_v61, %v474_v3  ;;  %v1506_v58 = vsub.f32 %v1473_v4, %v474_v3  ;;  %v1509_v1 = vsub.f32 %v1476_v11, %v474_v3  ;;  %v604_v0 = vld [vmem:[#allocation11 + $0xe8] sm:$0xff]  ;;  %v635_v2 = vld [vmem:[#allocation11 + $0x1e0] sm:$0xff] }
 0x247   :  { %v1514_v13 = vsub.f32 %v1480_v14, %v474_v3  ;;  %v597_v14 = vld [vmem:[#allocation11 + $0xb0] sm:$0xff]  ;;  %v636_v3 = vld [vmem:[#allocation11 + $0x1e8] sm:$0xff]  ;;  %1078 = vmatpush3.bf16.msra.mxu1 %v1077_v62 }
 0x248   :  { %v492_v12 = vadd.f32 %v491_v5, %v485_v45  ;;  %v487_v15 = vmul.f32 %v1503_v51, %v1503_v51  ;;  %v488_v61 = vmul.f32 %v1506_v58, %v1506_v58  ;;  %v489_v4 = vmul.f32 %v1509_v1, %v1509_v1 }
 0x249   :  { %v490_v11 = vmul.f32 %v1514_v13, %v1514_v13  ;;  %v1035_v22 = vpack.c.bf16 %v598_v20, %v597_v14  ;;  %v1047_v45 = vpack.c.bf16 %v604_v0, %v603_v56  ;;  %v1079_v5 = vpack.c.bf16 %v636_v3, %v635_v2  ;;  %v638_v14 = vld [vmem:[#allocation11 + $0x1f8] sm:$0xff]  ;;  %v589_v20 = vld [vmem:[#allocation11 + $0x70] sm:$0xff] }
 0x24a   :  { %v493_v16 = vadd.f32 %v492_v12, %v486_v7  ;;  %v496_v17 = vadd.f32 %v488_v61, %v487_v15  ;;  %v587_v7 = vld [vmem:[#allocation11 + $0x60] sm:$0xff]  ;;  %v588_v12 = vld [vmem:[#allocation11 + $0x68] sm:$0xff] }
 0x24b   :  { %1036 = vmatprep.subr.bf16.mxu0 %v1035_v22  ;;  %v619_v15 = vld [vmem:[#allocation11 + $0x160] sm:$0xff]  ;;  %v1049_v61 = vpack.c.bf16 %v588_v12, %v587_v7  ;;  %1080 = vmatprep.subr.bf16.mxu1 %v1079_v5  ;;  %v590_v22 = vld [vmem:[#allocation11 + $0x78] sm:$0xff] }
 0x24c   :  { %494 = vadd.xlane.f32.xlu1 %v493_v16  ;;  %v497_v18 = vadd.f32 %v496_v17, %v489_v4  ;;  %1038 = vmatpush3.bf16.msra.mxu0 %v1037_v27  ;;  %v620_v16 = vld [vmem:[#allocation11 + $0x168] sm:$0xff]  ;;  %v605_v4 = vld [vmem:[#allocation11 + $0xf0] sm:$0xff]  ;;  %v606_v17 = vld [vmem:[#allocation11 + $0xf8] sm:$0xff]  ;;  %v1053_v25 = vpack.c.bf16 %v590_v22, %v589_v20 }
 0x24d   :  { %1040 = vmatprep.subr.bf16.mxu0 %v1039_v34  ;;  %v545_v34 = vld [vmem:[#allocation10] sm:$0xf] }
 0x24e   :  { %v498_v19 = vadd.f32 %v497_v18, %v490_v11  ;;  %v1081_v11 = vpack.c.bf16 %v620_v16, %v619_v15  ;;  %v1051_v18 = vpack.c.bf16 %v606_v17, %v605_v4  ;;  %v554_v40 = vrot.slane %v545_v34, %v1452_v9 }
 0x24f   :  { %v562_v41 = vrot.slane %v545_v34, %v1454_v10  ;;  %v550_v42 = vrot.slane %v545_v34, %v1448_v6  ;;  %v558_v43 = vrot.slane %v545_v34, %v1450_v8 }
 0x250   :  { %499 = vadd.xlane.f32.xlu1 %v498_v19  ;;  %1042 = vmatpush3.bf16.msra.mxu0 %v1041_v39  ;;  %v637_v19 = vld [vmem:[#allocation11 + $0x1f0] sm:$0xff] }
 0x251   :  { %1044 = vmatprep.subr.bf16.mxu0 %v1043_v47  ;;  %v1083_v21 = vpack.c.bf16 %v638_v14, %v637_v19  ;;  %1082 = vmatpush3.bf16.msra.mxu1 %v1081_v11 }
 0x253   :  { %1084 = vmatprep.subr.bf16.mxu1 %v1083_v21 }
 0x254   :  { %1046 = vmatpush3.bf16.msra.mxu0 %v1045_v53 }
 0x255   :  { %1048 = vmatprep.subr.bf16.mxu0 %v1047_v45  ;;  %1086 = vmatpush3.bf16.msra.mxu1 %v1085_v26 }
 0x258   :  { %1050 = vmatpush3.bf16.msra.mxu0 %v1049_v61 }
 0x259   :  { %1052 = vmatprep.subr.bf16.mxu0 %v1051_v18 }
 0x25c   :  { %1054 = vmatpush3.bf16.msra.mxu0 %v1053_v25 }
 0x2d9   :  { %v495_v27 = vpop.xlane.xlu1 %494 }
 0x2da   :  { %v501_v28 = vmul.f32 0.001953125, %v495_v27 }
 0x2dc   :  { %v503_v29 = vadd.f32 1e-05, %v501_v28 }
 0x2dd   :  { %v500_v30 = vpop.xlane.xlu1 %499 }
 0x2de   :  { %1117 = vrsqrt.f32 %v503_v29  ;;  %v502_v31 = vmul.f32 0.001953125, %v500_v30 }
 0x2e0   :  { %v504_v32 = vadd.f32 1e-05, %v502_v31 }
 0x2e2   :  { %1119 = vrsqrt.f32 %v504_v32 }
 0x2e8   :  { %v1118_v39 = vpop.eup %1117 }
 0x2e9   :  { %v508_v44 = vmul.f32 %v1118_v39, %v1488_v59  ;;  %v510_v46 = vmul.f32 %v1118_v39, %v1494_v63  ;;  %v507_v47 = vmul.f32 %v1118_v39, %v1485_v57  ;;  %v509_v48 = vmul.f32 %v1118_v39, %v1491_v60 }
 0x2eb   :  { %v538_v49 = vmul.f32 %v524_v37, %v508_v44  ;;  %v540_v50 = vmul.f32 %v532_v38, %v510_v46  ;;  %v537_v52 = vmul.f32 %v520_v35, %v507_v47  ;;  %v539_v53 = vmul.f32 %v528_v36, %v509_v48 }
 0x2ec   :  { %v1120_v54 = vpop.eup %1119 }
 0x2ed   :  { %v568_v9 = vadd.f32 %v554_v40, %v538_v49  ;;  %v570_v55 = vadd.f32 %v562_v41, %v540_v50  ;;  %v567_v10 = vadd.f32 %v550_v42, %v537_v52  ;;  %v569_v56 = vadd.f32 %v558_v43, %v539_v53 }
 0x2ee   :  { %v512_v6 = vmul.f32 %v1120_v54, %v1506_v58  ;;  %v514_v8 = vmul.f32 %v1120_v54, %v1514_v13  ;;  %v511_v59 = vmul.f32 %v1120_v54, %v1503_v51  ;;  %v513_v63 = vmul.f32 %v1120_v54, %v1509_v1  ;;  %v818_v13 = vld [vmem:[#allocation13] ss:$0 sm:$0xff] }
 0x2ef   :  { %710 = vmatprep.mubr.f32.mxu0 %v568_v9  ;;  %785 = vmatprep.mubr.f32.mxu1 %v570_v55 }
 0x2f0   :  { %711 = vmatmul.mubr.f32.vlgmr.msra.gmra.mrb[4].mxu0 %v567_v10  ;;  %786 = vmatmul.mubr.f32.vlgmr.msra.gmra.mrb[4].mxu1 %v569_v56  ;;  %v542_v57 = vmul.f32 %v524_v37, %v512_v6  ;;  %v544_v60 = vmul.f32 %v532_v38, %v514_v8  ;;  %v541_v62 = vmul.f32 %v520_v35, %v511_v59 }
 0x2f1   :  { %v543_v0 = vmul.f32 %v528_v36, %v513_v63 }
 0x2f2   :  { %v572_v2 = vadd.f32 %v554_v40, %v542_v57  ;;  %v574_v3 = vadd.f32 %v562_v41, %v544_v60  ;;  %v571_v45 = vadd.f32 %v550_v42, %v541_v62 }
 0x2f3   :  { %v573_v5 = vadd.f32 %v558_v43, %v543_v0 }
 0x2f4   :  { %715 = vmatprep.mubr.f32.mxu0 %v572_v2  ;;  %790 = vmatprep.mubr.f32.mxu1 %v574_v3 }
 0x2f5   :  { %716 = vmatmul.mubr.f32.gmra.mrb[6].mxu0 %v571_v45  ;;  %791 = vmatmul.mubr.f32.gmra.mrb[6].mxu1 %v573_v5 }
 0x3c3   :  { %v851_v58 = vpop.f32.mrb[4].mxu0  ;;  %v889_v51 = vpop.f32.mrb[4].mxu1 }
 0x3c4   :  { %v852_v1 = vpop.f32.mrb[5].mxu0  ;;  %v890_v7 = vpop.f32.mrb[5].mxu1 }
 0x3c5   :  { %v853_v12 = vadd.f32 %v852_v1, %v851_v58  ;;  %v891_v15 = vadd.f32 %v890_v7, %v889_v51 }
 0x3c7   :  { %v713_v61 = vadd.f32 %v853_v12, %v818_v13 }
 0x3c8   :  { %v854_v16 = vpop.f32.mrb[6].mxu0  ;;  %v892_v4 = vpop.f32.mrb[6].mxu1 }
 0x3c9   :  { %v788_v17 = vadd.f32 %v891_v15, %v713_v61  ;;  %v855_v11 = vpop.f32.mrb[7].mxu0  ;;  %v893_v18 = vpop.f32.mrb[7].mxu1 }
 0x3ca   :  { %v856_v19 = vadd.f32 %v855_v11, %v854_v16  ;;  %v894_v14 = vadd.f32 %v893_v18, %v892_v4 }
 0x3cb   :  { %796 = vst [vmem:[#allocation14] sm:$0xff] %v788_v17 }
 0x3cc   :  { %v718_v20 = vadd.f32 %v856_v19, %v818_v13 }
 0x3ce   :  { %v793_v21 = vadd.f32 %v894_v14, %v718_v20 }
 0x3d0   :  { %797 = vst [vmem:[#allocation14 + $0x8] sm:$0xff] %v793_v21 }
 0x3d1   :  { %1286 = shalt.err (!%p1283_p4)
}
 0x3d2   :  { %s1287_s20 = scalar_lea.hbm %s1562_s7, 256 }
 0x3d3   :  { %p1288_p5 = scmp.ne.s32.totalorder %s1562_s7, %s1287_s20  ;;  %p1291_p6 = scmp.lt.u32.totalorder %s1287_s20, %s1562_s7 }
 0x3d5   :  { %p1293_p7 = pnand %p1291_p6, %p1288_p5 }
 0x3d7   :  { %1296 = shalt.err (!%p1293_p7)
}
 0x3d8   :  { %809 = dma.vmem_to_hbm [thread:$0]  %s804_s16, 256, %s1562_s7, [#allocation4], %s1312_s3, %s1312_s3, %s1313_s13  }
 0x3d9   :  { %1305 = dma.done.wait [#allocation4], 256  }
 0x3da   :  { %1306 = vsyncadd [#allocation4], 4294967040 }
 0x3db   :  { %813 = vsyncpa [#allocation3], 1 }
 0x3dc   :  { %814 = vsyncpa [#allocation6], 1 }
 0x3dd   :  { %815 = vsyncpa [#allocation9], 1 }
 0x3de   :  { %816 = vsyncpa [#allocation12], 1 }
 0x3df   :  { %817 = vsyncpa [#allocation4], 1 }

// kernel: tpu_custom_call.1
= control target key start
LH: loop header
LB: loop body
LE: loop exit
PB: predicated region body
PF: predicated region fallthrough
CT: control target
= control target key end

     0   :  { %12 = vsyncpa [#allocation3], 0  ;;  %s1555_s0 = inlined_call_operand.hbm [shape: f32[16,256], index: 0, kind: input, shape index: {}]   ;;  %s1556_s1 = inlined_call_operand.hbm [shape: f32[256,512], index: 1, kind: input, shape index: {}]   ;;  %s1557_s2 = inlined_call_operand.hbm [shape: f32[1,512], index: 2, kind: input, shape index: {}]   ;;  %s1558_s3 = inlined_call_operand.hbm [shape: f32[1,512], index: 3, kind: input, shape index: {}]   ;;  %s1559_s4 = inlined_call_operand.hbm [shape: f32[1,512], index: 4, kind: input, shape index: {}]   ;;  %s1560_s5 = inlined_call_operand.hbm [shape: f32[512,128], index: 5, kind: input, shape index: {}]   ;;  %s1561_s6 = inlined_call_operand.hbm [shape: f32[1,128], index: 6, kind: input, shape index: {}]   ;;  %s1562_s7 = inlined_call_operand.hbm [shape: f32[16,128], index: 7, kind: output, shape index: {}]  }
   0x1   :  { %13 = vsyncpa [#allocation6], 0 }
   0x2   :  { %14 = vsyncpa [#allocation9], 0 }
   0x3   :  { %15 = vsyncpa [#allocation12], 0 }
   0x4   :  { %16 = vsyncpa [#allocation4], 0  ;;  %s1307_s24 = smov [#allocation5]   ;;  %s1121_s28 = scalar_lea.hbm %s1556_s1, 16384 }
   0x5   :  { %s34_s25 = sshll.u32 %s1307_s24, 4  ;;  %p1122_p0 = scmp.ne.s32.totalorder %s1556_s1, %s1121_s28  ;;  %s35_s25 = int_to_ptr.vmem [resolvable:$true] %s34_s25 }
   0x6   :  { %p1125_p1 = scmp.lt.u32.totalorder %s1121_s28, %s1556_s1 }
   0x8   :  { %p1127_p2 = pnand %p1125_p1, %p1122_p0 }
   0xa   :  { %1130 = shalt.err (!%p1127_p2)
}
   0xb   :  { %s1131_s10 = scalar_lea.vmem %s35_s25, 16384  ;;  %p1136_p4 = scmp.lt.s32.totalorder %s35_s25, %s35_s25 }
   0xc   :  { %p1132_p3 = scmp.ne.s32.totalorder %s35_s25, %s1131_s10  ;;  %p1137_p5 = scmp.lt.s32.totalorder %s1131_s10, %s1131_s10 }
   0xe   :  { %p1138_p6 = por %p1137_p5, %p1136_p4 }
  0x10   :  { %p1139_p7 = pnand %p1138_p6, %p1132_p3 }
  0x12   :  { %1142 = shalt.err (!%p1139_p7)
}
  0x13   :  { %s1308_s11 = smov 512   ;;  %s1309_s12 = smov 32  }
  0x14   :  { %40 = dma.hbm_to_vmem [thread:$0]  %s1556_s1, 16384, %s35_s25, [#allocation6], %s1308_s11, %s1308_s11, %s1309_s12  }
  0x15   :  { %s1310_s15 = smov [#allocation8]   ;;  %s1311_s17 = smov [#allocation11]  }
  0x16   :  { %s57_s16 = sshll.u32 %s1310_s15, 4  ;;  %s76_s18 = sshll.u32 %s1311_s17, 4  ;;  %s58_s16 = int_to_ptr.vmem [resolvable:$true] %s57_s16  ;;  %s77_s18 = int_to_ptr.vmem [resolvable:$true] %s76_s18 }
  0x17   :  { %s1143_s21 = scalar_lea.hbm %s1558_s3, 64 }
  0x18   :  { %p1144_p8 = scmp.ne.s32.totalorder %s1558_s3, %s1143_s21  ;;  %p1147_p9 = scmp.lt.u32.totalorder %s1143_s21, %s1558_s3 }
  0x1a   :  { %p1149_p10 = pnand %p1147_p9, %p1144_p8 }
  0x1c   :  { %1152 = shalt.err (!%p1149_p10)
}
  0x1d   :  { %s1153_s1 = scalar_lea.vmem %s58_s16, 64  ;;  %p1158_p12 = scmp.lt.s32.totalorder %s58_s16, %s58_s16 }
  0x1e   :  { %p1154_p11 = scmp.ne.s32.totalorder %s58_s16, %s1153_s1  ;;  %p1159_p13 = scmp.lt.s32.totalorder %s1153_s1, %s1153_s1 }
  0x20   :  { %p1160_p0 = por %p1159_p13, %p1158_p12 }
  0x22   :  { %p1161_p1 = pnand %p1160_p0, %p1154_p11 }
  0x24   :  { %1164 = shalt.err (!%p1161_p1)
}
  0x25   :  { %60 = dma.hbm_to_vmem [thread:$0]  %s1558_s3, 64, %s58_s16, [#allocation9]  }
  0x26   :  { %s1165_s30 = scalar_lea.hbm %s1560_s5, 8192 }
  0x27   :  { %p1166_p2 = scmp.ne.s32.totalorder %s1560_s5, %s1165_s30  ;;  %p1169_p3 = scmp.lt.u32.totalorder %s1165_s30, %s1560_s5 }
  0x29   :  { %p1171_p4 = pnand %p1169_p3, %p1166_p2 }
  0x2b   :  { %1174 = shalt.err (!%p1171_p4)
}
  0x2c   :  { %s1175_s12 = scalar_lea.vmem %s77_s18, 8192  ;;  %p1180_p6 = scmp.lt.s32.totalorder %s77_s18, %s77_s18 }
  0x2d   :  { %p1176_p5 = scmp.ne.s32.totalorder %s77_s18, %s1175_s12  ;;  %p1181_p7 = scmp.lt.s32.totalorder %s1175_s12, %s1175_s12 }
  0x2f   :  { %p1182_p8 = por %p1181_p7, %p1180_p6 }
  0x31   :  { %p1183_p9 = pnand %p1182_p8, %p1176_p5 }
  0x33   :  { %1186 = shalt.err (!%p1183_p9)
}
  0x34   :  { %s1312_s3 = smov 128   ;;  %s1313_s13 = smov 8  }
  0x35   :  { %82 = dma.hbm_to_vmem [thread:$0]  %s1560_s5, 8192, %s77_s18, [#allocation12], %s1312_s3, %s1312_s3, %s1313_s13  }
  0x36   :  { %s1314_s16 = smov [#allocation2]   ;;  %s1187_s21 = scalar_lea.hbm %s1555_s0, 512 }
  0x37   :  { %s22_s17 = sshll.u32 %s1314_s16, 4  ;;  %p1188_p10 = scmp.ne.s32.totalorder %s1555_s0, %s1187_s21  ;;  %s23_s17 = int_to_ptr.vmem [resolvable:$true] %s22_s17 }
  0x38   :  { %p1191_p11 = scmp.lt.u32.totalorder %s1187_s21, %s1555_s0 }
  0x3a   :  { %p1193_p12 = pnand %p1191_p11, %p1188_p10 }
  0x3c   :  { %1196 = shalt.err (!%p1193_p12)
}
  0x3d   :  { %s1197_s1 = scalar_lea.vmem %s23_s17, 512  ;;  %p1202_p0 = scmp.lt.s32.totalorder %s23_s17, %s23_s17 }
  0x3e   :  { %p1198_p13 = scmp.ne.s32.totalorder %s23_s17, %s1197_s1  ;;  %p1203_p1 = scmp.lt.s32.totalorder %s1197_s1, %s1197_s1 }
  0x40   :  { %p1204_p2 = por %p1203_p1, %p1202_p0 }
  0x42   :  { %p1205_p3 = pnand %p1204_p2, %p1198_p13 }
  0x44   :  { %1208 = shalt.err (!%p1205_p3)
}
  0x45   :  { %s1315_s5 = smov 256   ;;  %s1316_s18 = smov 16  }
  0x46   :  { %28 = dma.hbm_to_vmem [thread:$0]  %s1555_s0, 512, %s23_s17, [#allocation3], %s1315_s5, %s1315_s5, %s1316_s18  }
  0x47   :  { %s1317_s28 = smov [#allocation7]   ;;  %s1318_s30 = smov [#allocation10]  }
  0x48   :  { %s47_s29 = sshll.u32 %s1317_s28, 4  ;;  %s67_s8 = sshll.u32 %s1318_s30, 4  ;;  %s48_s29 = int_to_ptr.vmem [resolvable:$true] %s47_s29  ;;  %s68_s8 = int_to_ptr.vmem [resolvable:$true] %s67_s8 }
  0x49   :  { %s1209_s11 = scalar_lea.hbm %s1557_s2, 64 }
  0x4a   :  { %p1210_p4 = scmp.ne.s32.totalorder %s1557_s2, %s1209_s11  ;;  %p1213_p5 = scmp.lt.u32.totalorder %s1209_s11, %s1557_s2 }
  0x4c   :  { %p1215_p6 = pnand %p1213_p5, %p1210_p4 }
  0x4e   :  { %1218 = shalt.err (!%p1215_p6)
}
  0x4f   :  { %s1219_s0 = scalar_lea.vmem %s48_s29, 64  ;;  %p1224_p8 = scmp.lt.s32.totalorder %s48_s29, %s48_s29 }
  0x50   :  { %p1220_p7 = scmp.ne.s32.totalorder %s48_s29, %s1219_s0  ;;  %p1225_p9 = scmp.lt.s32.totalorder %s1219_s0, %s1219_s0 }
  0x52   :  { %p1226_p10 = por %p1225_p9, %p1224_p8 }
  0x54   :  { %p1227_p11 = pnand %p1226_p10, %p1220_p7 }
  0x56   :  { %1230 = shalt.err (!%p1227_p11)
}
  0x57   :  { %50 = dma.hbm_to_vmem [thread:$0]  %s1557_s2, 64, %s48_s29, [#allocation6]  }
  0x58   :  { %s1231_s22 = scalar_lea.hbm %s1559_s4, 64 }
  0x59   :  { %p1232_p12 = scmp.ne.s32.totalorder %s1559_s4, %s1231_s22  ;;  %p1235_p13 = scmp.lt.u32.totalorder %s1231_s22, %s1559_s4 }
  0x5b   :  { %p1237_p0 = pnand %p1235_p13, %p1232_p12 }
  0x5d   :  { %1240 = shalt.err (!%p1237_p0)
}
  0x5e   :  { %s1241_s5 = scalar_lea.vmem %s68_s8, 64  ;;  %p1246_p2 = scmp.lt.s32.totalorder %s68_s8, %s68_s8 }
  0x5f   :  { %p1242_p1 = scmp.ne.s32.totalorder %s68_s8, %s1241_s5  ;;  %p1247_p3 = scmp.lt.s32.totalorder %s1241_s5, %s1241_s5 }
  0x61   :  { %p1248_p4 = por %p1247_p3, %p1246_p2 }
  0x63   :  { %p1249_p5 = pnand %p1248_p4, %p1242_p1 }
  0x65   :  { %1252 = shalt.err (!%p1249_p5)
}
  0x66   :  { %70 = dma.hbm_to_vmem [thread:$0]  %s1559_s4, 64, %s68_s8, [#allocation9]  }
  0x67   :  { %s1319_s25 = smov [#allocation13]   ;;  %s1253_s30 = scalar_lea.hbm %s1561_s6, 16 }
  0x68   :  { %s89_s27 = sshll.u32 %s1319_s25, 4  ;;  %p1254_p6 = scmp.ne.s32.totalorder %s1561_s6, %s1253_s30  ;;  %s90_s27 = int_to_ptr.vmem [resolvable:$true] %s89_s27 }
  0x69   :  { %p1257_p7 = scmp.lt.u32.totalorder %s1253_s30, %s1561_s6 }
  0x6b   :  { %p1259_p8 = pnand %p1257_p7, %p1254_p6 }
  0x6d   :  { %1262 = shalt.err (!%p1259_p8)
}
  0x6e   :  { %s1263_s14 = scalar_lea.vmem %s90_s27, 16  ;;  %s1267_s4 = scalar_lea.vmem %s90_s27, 32 }
  0x6f   :  { %p1264_p9 = scmp.ne.s32.totalorder %s90_s27, %s1263_s14  ;;  %p1268_p10 = scmp.lt.s32.totalorder %s90_s27, %s90_s27 }
  0x70   :  { %p1269_p11 = scmp.lt.s32.totalorder %s1267_s4, %s1263_s14 }
  0x72   :  { %p1270_p12 = por %p1269_p11, %p1268_p10 }
  0x74   :  { %p1271_p13 = pnand %p1270_p12, %p1264_p9 }
  0x76   :  { %1274 = shalt.err (!%p1271_p13)
}
  0x77   :  { %92 = dma.hbm_to_vmem [thread:$0]  %s1561_s6, 16, %s90_s27, [#allocation12]  }
  0x78   :  { %1297 = dma.done.wait [#allocation3], 512  }
  0x79   :  { %1298 = vsyncadd [#allocation3], 4294966784 }
  0x7a   :  { %1299 = dma.done.wait [#allocation6], 16448  }
  0x7b   :  { %1300 = vsyncadd [#allocation6], 4294950848 }
  0x7c   :  { %1301 = dma.done.wait [#allocation9], 128  }
  0x7d   :  { %1302 = vsyncadd [#allocation9], 4294967168 }
  0x7e   :  { %1303 = dma.done.wait [#allocation12], 8208  }
  0x7f   :  { %1304 = vsyncadd [#allocation12], 4294959088  ;;  %v119_v0 = vld [vmem:[#allocation5 + $0x8] sm:$0xff]  ;;  %v121_v2 = vld [vmem:[#allocation5 + $0x18] sm:$0xff]  ;;  %s1320_s6 = smov [#allocation14]  }
  0x80   :  { %v123_v1 = vld [vmem:[#allocation5 + $0x28] sm:$0xff]  ;;  %v125_v4 = vld [vmem:[#allocation5 + $0x38] sm:$0xff]  ;;  %v118_v5 = vld [vmem:[#allocation5] sm:$0xff]  ;;  %s803_s16 = sshll.u32 %s1320_s6, 4  ;;  %s804_s16 = int_to_ptr.vmem [resolvable:$true] %s803_s16 }
  0x81   :  { %v895_v3 = vpack.c.bf16 %v123_v1, %v119_v0  ;;  %v122_v6 = vld [vmem:[#allocation5 + $0x20] sm:$0xff]  ;;  %v959_v7 = vpack.c.bf16 %v125_v4, %v121_v2  ;;  %v120_v9 = vld [vmem:[#allocation5 + $0x10] sm:$0xff]  ;;  %v127_v11 = vld [vmem:[#allocation5 + $0x48] sm:$0xff]  ;;  %s1275_s0 = scalar_lea.vmem %s804_s16, 256  ;;  %p1280_p1 = scmp.lt.s32.totalorder %s804_s16, %s804_s16 }
  0x82   :  { %v897_v8 = vpack.c.bf16 %v122_v6, %v118_v5  ;;  %v124_v10 = vld [vmem:[#allocation5 + $0x30] sm:$0xff]  ;;  %v131_v13 = vld [vmem:[#allocation5 + $0x68] sm:$0xff]  ;;  %v129_v14 = vld [vmem:[#allocation5 + $0x58] sm:$0xff]  ;;  %p1276_p0 = scmp.ne.s32.totalorder %s804_s16, %s1275_s0  ;;  %p1281_p2 = scmp.lt.s32.totalorder %s1275_s0, %s1275_s0 }
  0x83   :  { %896 = vmatprep.subr.bf16.mxu0 %v895_v3  ;;  %v961_v12 = vpack.c.bf16 %v124_v10, %v120_v9  ;;  %v133_v15 = vld [vmem:[#allocation5 + $0x78] sm:$0xff]  ;;  %960 = vmatprep.subr.bf16.mxu1 %v959_v7  ;;  %v899_v16 = vpack.c.bf16 %v131_v13, %v127_v11  ;;  %v126_v18 = vld [vmem:[#allocation5 + $0x40] sm:$0xff]  ;;  %v128_v20 = vld [vmem:[#allocation5 + $0x50] sm:$0xff] }
  0x84   :  { %898 = vmatpush1.bf16.msra.mxu0 %v897_v8  ;;  %v963_v17 = vpack.c.bf16 %v133_v15, %v129_v14  ;;  %v130_v19 = vld [vmem:[#allocation5 + $0x60] sm:$0xff]  ;;  %v132_v22 = vld [vmem:[#allocation5 + $0x70] sm:$0xff]  ;;  %v135_v23 = vld [vmem:[#allocation5 + $0x88] sm:$0xff]  ;;  %p1282_p3 = por %p1281_p2, %p1280_p1 }
  0x85   :  { %962 = vmatpush1.bf16.msra.mxu1 %v961_v12  ;;  %v901_v21 = vpack.c.bf16 %v130_v19, %v126_v18  ;;  %v139_v24 = vld [vmem:[#allocation5 + $0xa8] sm:$0xff]  ;;  %900 = vmatprep.subr.bf16.mxu0 %v899_v16  ;;  %v965_v25 = vpack.c.bf16 %v132_v22, %v128_v20  ;;  %v137_v27 = vld [vmem:[#allocation5 + $0x98] sm:$0xff]  ;;  %v134_v29 = vld [vmem:[#allocation5 + $0x80] sm:$0xff] }
  0x86   :  { %964 = vmatprep.subr.bf16.mxu1 %v963_v17  ;;  %v903_v26 = vpack.c.bf16 %v139_v24, %v135_v23  ;;  %v141_v28 = vld [vmem:[#allocation5 + $0xb8] sm:$0xff]  ;;  %v138_v31 = vld [vmem:[#allocation5 + $0xa0] sm:$0xff]  ;;  %v136_v32 = vld [vmem:[#allocation5 + $0x90] sm:$0xff]  ;;  %p1283_p4 = pnand %p1282_p3, %p1276_p0 }
  0x87   :  { %v967_v30 = vpack.c.bf16 %v141_v28, %v137_v27  ;;  %v140_v33 = vld [vmem:[#allocation5 + $0xb0] sm:$0xff]  ;;  %v905_v34 = vpack.c.bf16 %v138_v31, %v134_v29  ;;  %v143_v35 = vld [vmem:[#allocation5 + $0xc8] sm:$0xff]  ;;  %v145_v37 = vld [vmem:[#allocation5 + $0xd8] sm:$0xff] }
  0x88   :  { %902 = vmatpush1.bf16.msra.mxu0 %v901_v21  ;;  %v147_v36 = vld [vmem:[#allocation5 + $0xe8] sm:$0xff]  ;;  %v969_v38 = vpack.c.bf16 %v140_v33, %v136_v32  ;;  %v149_v40 = vld [vmem:[#allocation5 + $0xf8] sm:$0xff]  ;;  %v142_v41 = vld [vmem:[#allocation5 + $0xc0] sm:$0xff] }
  0x89   :  { %966 = vmatpush1.bf16.msra.mxu1 %v965_v25  ;;  %904 = vmatprep.subr.bf16.mxu0 %v903_v26  ;;  %v907_v39 = vpack.c.bf16 %v147_v36, %v143_v35  ;;  %v146_v42 = vld [vmem:[#allocation5 + $0xe0] sm:$0xff]  ;;  %v971_v43 = vpack.c.bf16 %v149_v40, %v145_v37  ;;  %v144_v44 = vld [vmem:[#allocation5 + $0xd0] sm:$0xff]  ;;  %v151_v46 = vld [vmem:[#allocation5 + $0x108] sm:$0xff] }
  0x8a   :  { %968 = vmatprep.subr.bf16.mxu1 %v967_v30  ;;  %v148_v45 = vld [vmem:[#allocation5 + $0xf0] sm:$0xff]  ;;  %v155_v47 = vld [vmem:[#allocation5 + $0x128] sm:$0xff]  ;;  %v153_v48 = vld [vmem:[#allocation5 + $0x118] sm:$0xff]  ;;  %v909_v50 = vpack.c.bf16 %v146_v42, %v142_v41 }
  0x8b   :  { %v157_v49 = vld [vmem:[#allocation5 + $0x138] sm:$0xff]  ;;  %v973_v51 = vpack.c.bf16 %v148_v45, %v144_v44  ;;  %v911_v52 = vpack.c.bf16 %v155_v47, %v151_v46  ;;  %v150_v53 = vld [vmem:[#allocation5 + $0x100] sm:$0xff]  ;;  %v152_v55 = vld [vmem:[#allocation5 + $0x110] sm:$0xff] }
  0x8c   :  { %906 = vmatpush1.bf16.msra.mxu0 %v905_v34  ;;  %v154_v54 = vld [vmem:[#allocation5 + $0x120] sm:$0xff]  ;;  %v975_v56 = vpack.c.bf16 %v157_v49, %v153_v48  ;;  %v156_v57 = vld [vmem:[#allocation5 + $0x130] sm:$0xff]  ;;  %v159_v58 = vld [vmem:[#allocation5 + $0x148] sm:$0xff] }
  0x8d   :  { %970 = vmatpush1.bf16.msra.mxu1 %v969_v38  ;;  %908 = vmatprep.subr.bf16.mxu0 %v907_v39  ;;  %v163_v59 = vld [vmem:[#allocation5 + $0x168] sm:$0xff]  ;;  %v161_v60 = vld [vmem:[#allocation5 + $0x158] sm:$0xff]  ;;  %v913_v62 = vpack.c.bf16 %v154_v54, %v150_v53  ;;  %v977_v63 = vpack.c.bf16 %v156_v57, %v152_v55  ;;  %v158_v1 = vld [vmem:[#allocation5 + $0x140] sm:$0xff] }
  0x8e   :  { %972 = vmatprep.subr.bf16.mxu1 %v971_v43  ;;  %v165_v61 = vld [vmem:[#allocation5 + $0x178] sm:$0xff]  ;;  %v915_v0 = vpack.c.bf16 %v163_v59, %v159_v58  ;;  %v162_v2 = vld [vmem:[#allocation5 + $0x160] sm:$0xff]  ;;  %v160_v3 = vld [vmem:[#allocation5 + $0x150] sm:$0xff] }
  0x8f   :  { %v979_v4 = vpack.c.bf16 %v165_v61, %v161_v60  ;;  %v164_v5 = vld [vmem:[#allocation5 + $0x170] sm:$0xff]  ;;  %v167_v6 = vld [vmem:[#allocation5 + $0x188] sm:$0xff]  ;;  %v169_v8 = vld [vmem:[#allocation5 + $0x198] sm:$0xff]  ;;  %v917_v10 = vpack.c.bf16 %v162_v2, %v158_v1 }
  0x90   :  { %910 = vmatpush1.bf16.msra.mxu0 %v909_v50  ;;  %v171_v7 = vld [vmem:[#allocation5 + $0x1a8] sm:$0xff]  ;;  %v173_v9 = vld [vmem:[#allocation5 + $0x1b8] sm:$0xff]  ;;  %v981_v11 = vpack.c.bf16 %v164_v5, %v160_v3  ;;  %v166_v13 = vld [vmem:[#allocation5 + $0x180] sm:$0xff] }
  0x91   :  { %974 = vmatpush1.bf16.msra.mxu1 %v973_v51  ;;  %912 = vmatprep.subr.bf16.mxu0 %v911_v52  ;;  %v919_v12 = vpack.c.bf16 %v171_v7, %v167_v6  ;;  %v170_v14 = vld [vmem:[#allocation5 + $0x1a0] sm:$0xff]  ;;  %v168_v15 = vld [vmem:[#allocation5 + $0x190] sm:$0xff]  ;;  %v983_v16 = vpack.c.bf16 %v173_v9, %v169_v8  ;;  %v175_v18 = vld [vmem:[#allocation5 + $0x1c8] sm:$0xff] }
  0x92   :  { %976 = vmatprep.subr.bf16.mxu1 %v975_v56  ;;  %v172_v17 = vld [vmem:[#allocation5 + $0x1b0] sm:$0xff]  ;;  %v179_v19 = vld [vmem:[#allocation5 + $0x1e8] sm:$0xff]  ;;  %v177_v20 = vld [vmem:[#allocation5 + $0x1d8] sm:$0xff]  ;;  %v921_v22 = vpack.c.bf16 %v170_v14, %v166_v13 }
  0x93   :  { %v181_v21 = vld [vmem:[#allocation5 + $0x1f8] sm:$0xff]  ;;  %v985_v23 = vpack.c.bf16 %v172_v17, %v168_v15  ;;  %v923_v24 = vpack.c.bf16 %v179_v19, %v175_v18  ;;  %v174_v25 = vld [vmem:[#allocation5 + $0x1c0] sm:$0xff]  ;;  %v176_v27 = vld [vmem:[#allocation5 + $0x1d0] sm:$0xff] }
  0x94   :  { %914 = vmatpush1.bf16.msra.mxu0 %v913_v62  ;;  %v178_v26 = vld [vmem:[#allocation5 + $0x1e0] sm:$0xff]  ;;  %v987_v28 = vpack.c.bf16 %v181_v21, %v177_v20  ;;  %v180_v29 = vld [vmem:[#allocation5 + $0x1f0] sm:$0xff]  ;;  %v183_v30 = vld [vmem:[#allocation5 + $0x208] sm:$0xff] }
  0x95   :  { %978 = vmatpush1.bf16.msra.mxu1 %v977_v63  ;;  %916 = vmatprep.subr.bf16.mxu0 %v915_v0  ;;  %v187_v31 = vld [vmem:[#allocation5 + $0x228] sm:$0xff]  ;;  %v185_v32 = vld [vmem:[#allocation5 + $0x218] sm:$0xff]  ;;  %v925_v34 = vpack.c.bf16 %v178_v26, %v174_v25  ;;  %v989_v35 = vpack.c.bf16 %v180_v29, %v176_v27  ;;  %v182_v37 = vld [vmem:[#allocation5 + $0x200] sm:$0xff] }
  0x96   :  { %980 = vmatprep.subr.bf16.mxu1 %v979_v4  ;;  %v189_v33 = vld [vmem:[#allocation5 + $0x238] sm:$0xff]  ;;  %v927_v36 = vpack.c.bf16 %v187_v31, %v183_v30  ;;  %v186_v38 = vld [vmem:[#allocation5 + $0x220] sm:$0xff]  ;;  %v184_v39 = vld [vmem:[#allocation5 + $0x210] sm:$0xff] }
  0x97   :  { %v991_v40 = vpack.c.bf16 %v189_v33, %v185_v32  ;;  %v188_v41 = vld [vmem:[#allocation5 + $0x230] sm:$0xff]  ;;  %v191_v42 = vld [vmem:[#allocation5 + $0x248] sm:$0xff]  ;;  %v193_v44 = vld [vmem:[#allocation5 + $0x258] sm:$0xff]  ;;  %v929_v46 = vpack.c.bf16 %v186_v38, %v182_v37 }
  0x98   :  { %918 = vmatpush1.bf16.msra.mxu0 %v917_v10  ;;  %v195_v43 = vld [vmem:[#allocation5 + $0x268] sm:$0xff]  ;;  %v197_v45 = vld [vmem:[#allocation5 + $0x278] sm:$0xff]  ;;  %v993_v47 = vpack.c.bf16 %v188_v41, %v184_v39  ;;  %v190_v49 = vld [vmem:[#allocation5 + $0x240] sm:$0xff] }
  0x99   :  { %982 = vmatpush1.bf16.msra.mxu1 %v981_v11  ;;  %920 = vmatprep.subr.bf16.mxu0 %v919_v12  ;;  %v931_v48 = vpack.c.bf16 %v195_v43, %v191_v42  ;;  %v194_v50 = vld [vmem:[#allocation5 + $0x260] sm:$0xff]  ;;  %v192_v51 = vld [vmem:[#allocation5 + $0x250] sm:$0xff]  ;;  %v995_v52 = vpack.c.bf16 %v197_v45, %v193_v44  ;;  %v199_v54 = vld [vmem:[#allocation5 + $0x288] sm:$0xff] }
  0x9a   :  { %984 = vmatprep.subr.bf16.mxu1 %v983_v16  ;;  %v196_v53 = vld [vmem:[#allocation5 + $0x270] sm:$0xff]  ;;  %v203_v55 = vld [vmem:[#allocation5 + $0x2a8] sm:$0xff]  ;;  %v201_v56 = vld [vmem:[#allocation5 + $0x298] sm:$0xff]  ;;  %v933_v58 = vpack.c.bf16 %v194_v50, %v190_v49 }
  0x9b   :  { %v205_v57 = vld [vmem:[#allocation5 + $0x2b8] sm:$0xff]  ;;  %v997_v59 = vpack.c.bf16 %v196_v53, %v192_v51  ;;  %v935_v60 = vpack.c.bf16 %v203_v55, %v199_v54  ;;  %v198_v61 = vld [vmem:[#allocation5 + $0x280] sm:$0xff]  ;;  %v200_v63 = vld [vmem:[#allocation5 + $0x290] sm:$0xff] }
  0x9c   :  { %922 = vmatpush1.bf16.msra.mxu0 %v921_v22  ;;  %v202_v62 = vld [vmem:[#allocation5 + $0x2a0] sm:$0xff]  ;;  %v999_v0 = vpack.c.bf16 %v205_v57, %v201_v56  ;;  %v204_v1 = vld [vmem:[#allocation5 + $0x2b0] sm:$0xff]  ;;  %v207_v2 = vld [vmem:[#allocation5 + $0x2c8] sm:$0xff] }
  0x9d   :  { %986 = vmatpush1.bf16.msra.mxu1 %v985_v23  ;;  %924 = vmatprep.subr.bf16.mxu0 %v923_v24  ;;  %v211_v3 = vld [vmem:[#allocation5 + $0x2e8] sm:$0xff]  ;;  %v209_v4 = vld [vmem:[#allocation5 + $0x2d8] sm:$0xff]  ;;  %v937_v6 = vpack.c.bf16 %v202_v62, %v198_v61  ;;  %v206_v7 = vld [vmem:[#allocation5 + $0x2c0] sm:$0xff]  ;;  %v1001_v8 = vpack.c.bf16 %v204_v1, %v200_v63 }
  0x9e   :  { %988 = vmatprep.subr.bf16.mxu1 %v987_v28  ;;  %v213_v5 = vld [vmem:[#allocation5 + $0x2f8] sm:$0xff]  ;;  %v939_v9 = vpack.c.bf16 %v211_v3, %v207_v2  ;;  %v210_v10 = vld [vmem:[#allocation5 + $0x2e0] sm:$0xff]  ;;  %v208_v11 = vld [vmem:[#allocation5 + $0x2d0] sm:$0xff] }
  0x9f   :  { %v212_v12 = vld [vmem:[#allocation5 + $0x2f0] sm:$0xff]  ;;  %v1003_v13 = vpack.c.bf16 %v213_v5, %v209_v4  ;;  %v215_v14 = vld [vmem:[#allocation5 + $0x308] sm:$0xff]  ;;  %v217_v17 = vld [vmem:[#allocation5 + $0x318] sm:$0xff]  ;;  %v941_v19 = vpack.c.bf16 %v210_v10, %v206_v7  ;;  %v248_v4 = vlaneseq }
  0xa0   :  { %926 = vmatpush1.bf16.msra.mxu0 %v925_v34  ;;  %v219_v15 = vld [vmem:[#allocation5 + $0x328] sm:$0xff]  ;;  %v221_v18 = vld [vmem:[#allocation5 + $0x338] sm:$0xff]  ;;  %v1005_v20 = vpack.c.bf16 %v212_v12, %v208_v11  ;;  %v214_v22 = vld [vmem:[#allocation5 + $0x300] sm:$0xff] }
  0xa1   :  { %990 = vmatpush1.bf16.msra.mxu1 %v989_v35  ;;  %928 = vmatprep.subr.bf16.mxu0 %v927_v36  ;;  %v115_v16 = vld [vmem:[#allocation2 + $0x8] sm:$0xff]  ;;  %v943_v21 = vpack.c.bf16 %v219_v15, %v215_v14  ;;  %v218_v23 = vld [vmem:[#allocation5 + $0x320] sm:$0xff]  ;;  %v216_v24 = vld [vmem:[#allocation5 + $0x310] sm:$0xff]  ;;  %v1007_v25 = vpack.c.bf16 %v221_v18, %v217_v17  ;;  %v249_v5 = vshrl.u32 %v248_v4, 7 }
  0xa2   :  { %992 = vmatprep.subr.bf16.mxu1 %v991_v40  ;;  %332 = vmatprep.mubr.f32.mxu0 %v115_v16  ;;  %v220_v26 = vld [vmem:[#allocation5 + $0x330] sm:$0xff]  ;;  %v223_v27 = vld [vmem:[#allocation5 + $0x348] sm:$0xff]  ;;  %v225_v29 = vld [vmem:[#allocation5 + $0x358] sm:$0xff]  ;;  %v945_v31 = vpack.c.bf16 %v218_v23, %v214_v22 }
  0xa3   :  { %409 = vmatprep.mubr.f32.mxu1 %v115_v16  ;;  %v227_v28 = vld [vmem:[#allocation5 + $0x368] sm:$0xff]  ;;  %v229_v30 = vld [vmem:[#allocation5 + $0x378] sm:$0xff]  ;;  %v1009_v32 = vpack.c.bf16 %v220_v26, %v216_v24  ;;  %v222_v34 = vld [vmem:[#allocation5 + $0x340] sm:$0xff]  ;;  %v1454_v10 = vsub.s32 3, %v249_v5 }
  0xa4   :  { %930 = vmatpush1.bf16.msra.mxu0 %v929_v46  ;;  %v947_v33 = vpack.c.bf16 %v227_v28, %v223_v27  ;;  %v226_v35 = vld [vmem:[#allocation5 + $0x360] sm:$0xff]  ;;  %v224_v36 = vld [vmem:[#allocation5 + $0x350] sm:$0xff]  ;;  %v1011_v37 = vpack.c.bf16 %v229_v30, %v225_v29  ;;  %v231_v39 = vld [vmem:[#allocation5 + $0x388] sm:$0xff] }
  0xa5   :  { %994 = vmatpush1.bf16.msra.mxu1 %v993_v47  ;;  %932 = vmatprep.subr.bf16.mxu0 %v931_v48  ;;  %v228_v38 = vld [vmem:[#allocation5 + $0x370] sm:$0xff]  ;;  %v235_v40 = vld [vmem:[#allocation5 + $0x3a8] sm:$0xff]  ;;  %v233_v41 = vld [vmem:[#allocation5 + $0x398] sm:$0xff]  ;;  %v949_v43 = vpack.c.bf16 %v226_v35, %v222_v34 }
  0xa6   :  { %996 = vmatprep.subr.bf16.mxu1 %v995_v52  ;;  %v237_v42 = vld [vmem:[#allocation5 + $0x3b8] sm:$0xff]  ;;  %v1013_v44 = vpack.c.bf16 %v228_v38, %v224_v36  ;;  %v951_v45 = vpack.c.bf16 %v235_v40, %v231_v39  ;;  %v230_v46 = vld [vmem:[#allocation5 + $0x380] sm:$0xff]  ;;  %v232_v48 = vld [vmem:[#allocation5 + $0x390] sm:$0xff] }
  0xa7   :  { %v234_v47 = vld [vmem:[#allocation5 + $0x3a0] sm:$0xff]  ;;  %v1015_v49 = vpack.c.bf16 %v237_v42, %v233_v41  ;;  %v236_v50 = vld [vmem:[#allocation5 + $0x3b0] sm:$0xff]  ;;  %v239_v51 = vld [vmem:[#allocation5 + $0x3c8] sm:$0xff] }
  0xa8   :  { %934 = vmatpush1.bf16.msra.mxu0 %v933_v58  ;;  %v243_v52 = vld [vmem:[#allocation5 + $0x3e8] sm:$0xff]  ;;  %v241_v53 = vld [vmem:[#allocation5 + $0x3d8] sm:$0xff]  ;;  %v953_v55 = vpack.c.bf16 %v234_v47, %v230_v46  ;;  %v1017_v56 = vpack.c.bf16 %v236_v50, %v232_v48  ;;  %v238_v58 = vld [vmem:[#allocation5 + $0x3c0] sm:$0xff] }
  0xa9   :  { %998 = vmatpush1.bf16.msra.mxu1 %v997_v59  ;;  %936 = vmatprep.subr.bf16.mxu0 %v935_v60  ;;  %v245_v54 = vld [vmem:[#allocation5 + $0x3f8] sm:$0xff]  ;;  %v955_v57 = vpack.c.bf16 %v243_v52, %v239_v51  ;;  %v242_v59 = vld [vmem:[#allocation5 + $0x3e0] sm:$0xff]  ;;  %v240_v61 = vld [vmem:[#allocation5 + $0x3d0] sm:$0xff] }
  0xaa   :  { %1000 = vmatprep.subr.bf16.mxu1 %v999_v0  ;;  %v1019_v60 = vpack.c.bf16 %v245_v54, %v241_v53  ;;  %v244_v62 = vld [vmem:[#allocation5 + $0x3f0] sm:$0xff]  ;;  %v957_v63 = vpack.c.bf16 %v242_v59, %v238_v58  ;;  %v114_v1 = vld [vmem:[#allocation2] sm:$0xff]  ;;  %v117_v2 = vld [vmem:[#allocation2 + $0x18] sm:$0xff] }
  0xab   :  { %v1021_v0 = vpack.c.bf16 %v244_v62, %v240_v61  ;;  %v116_v3 = vld [vmem:[#allocation2 + $0x10] sm:$0xff]  ;;  %v246_v7 = vld [vmem:[#allocation7] sm:$0xf] }
  0xac   :  { %938 = vmatpush1.bf16.msra.mxu0 %v937_v6  ;;  %v1448_v6 = vsub.s32 0, %v249_v5  ;;  %v263_v14 = vrot.slane %v246_v7, %v1454_v10 }
  0xad   :  { %1002 = vmatpush1.bf16.msra.mxu1 %v1001_v8  ;;  %940 = vmatprep.subr.bf16.mxu0 %v939_v9  ;;  %v1450_v8 = vsub.s32 2, %v249_v5  ;;  %v1452_v9 = vsub.s32 1, %v249_v5 }
  0xae   :  { %1004 = vmatprep.subr.bf16.mxu1 %v1003_v13  ;;  %v251_v11 = vrot.slane %v246_v7, %v1448_v6 }
  0xaf   :  { %v259_v12 = vrot.slane %v246_v7, %v1450_v8  ;;  %v255_v13 = vrot.slane %v246_v7, %v1452_v9 }
  0xb0   :  { %942 = vmatpush1.bf16.msra.mxu0 %v941_v19 }
  0xb1   :  { %1006 = vmatpush1.bf16.msra.mxu1 %v1005_v20  ;;  %944 = vmatprep.subr.bf16.mxu0 %v943_v21 }
  0xb2   :  { %1008 = vmatprep.subr.bf16.mxu1 %v1007_v25 }
  0xb4   :  { %946 = vmatpush1.bf16.msra.mxu0 %v945_v31 }
  0xb5   :  { %1010 = vmatpush1.bf16.msra.mxu1 %v1009_v32  ;;  %948 = vmatprep.subr.bf16.mxu0 %v947_v33 }
  0xb6   :  { %1012 = vmatprep.subr.bf16.mxu1 %v1011_v37 }
  0xb8   :  { %950 = vmatpush1.bf16.msra.mxu0 %v949_v43 }
  0xb9   :  { %1014 = vmatpush1.bf16.msra.mxu1 %v1013_v44  ;;  %952 = vmatprep.subr.bf16.mxu0 %v951_v45 }
  0xba   :  { %1016 = vmatprep.subr.bf16.mxu1 %v1015_v49 }
  0xbc   :  { %954 = vmatpush1.bf16.msra.mxu0 %v953_v55 }
  0xbd   :  { %1018 = vmatpush1.bf16.msra.mxu1 %v1017_v56  ;;  %956 = vmatprep.subr.bf16.mxu0 %v955_v57 }
  0xbe   :  { %1020 = vmatprep.subr.bf16.mxu1 %v1019_v60 }
  0xc0   :  { %958 = vmatpush1.bf16.msra.mxu0 %v957_v63 }
  0xc1   :  { %1022 = vmatpush1.bf16.msra.mxu1 %v1021_v0 }
  0xc3   :  { %333 = vmatmul.mubr.f32.vlgmr.msra.gmra.mrb[0].mxu0 %v114_v1 }
  0xc4   :  { %410 = vmatmul.mubr.f32.vlgmr.msra.gmra.mrb[0].mxu1 %v114_v1  ;;  %338 = vmatprep.mubr.f32.mxu0 %v117_v2 }
  0xc5   :  { %415 = vmatprep.mubr.f32.mxu1 %v117_v2 }
  0xc7   :  { %339 = vmatmul.mubr.f32.gmra.mrb[2].mxu0 %v116_v3 }
  0xc8   :  { %416 = vmatmul.mubr.f32.gmra.mrb[2].mxu1 %v116_v3 }
 0x196   :  { %v334_v15 = vpop.f32.mrb[0].mxu0 }
 0x197   :  { %v335_v16 = vadd.f32 %v334_v15, %v251_v11  ;;  %v411_v17 = vpop.f32.mrb[0].mxu1  ;;  %v336_v18 = vpop.f32.mrb[1].mxu0 }
 0x198   :  { %v412_v19 = vadd.f32 %v411_v17, %v259_v12  ;;  %v337_v20 = vadd.f32 %v336_v18, %v255_v13  ;;  %v413_v21 = vpop.f32.mrb[1].mxu1  ;;  %v591_v17 = vld [vmem:[#allocation11 + $0x80] sm:$0xff]  ;;  %v592_v18 = vld [vmem:[#allocation11 + $0x88] sm:$0xff] }
 0x199   :  { %v430_v22 = vmul.f32 0.70710677, %v335_v16  ;;  %v414_v23 = vadd.f32 %v413_v21, %v263_v14  ;;  %v422_v41 = vmul.f32 0.5, %v335_v16  ;;  %v624_v21 = vld [vmem:[#allocation11 + $0x188] sm:$0xff] }
 0x19a   :  { %v432_v24 = vmul.f32 0.70710677, %v412_v19  ;;  %v431_v25 = vmul.f32 0.70710677, %v337_v20  ;;  %v340_v27 = vpop.f32.mrb[2].mxu0  ;;  %v423_v47 = vmul.f32 0.5, %v337_v20  ;;  %v1023_v20 = vpack.c.bf16 %v592_v18, %v591_v17 }
 0x19b   :  { %1101 = verf.f32 %v430_v22  ;;  %v433_v26 = vmul.f32 0.70710677, %v414_v23  ;;  %v417_v28 = vpop.f32.mrb[2].mxu1  ;;  %v341_v29 = vadd.f32 %v340_v27, %v251_v11  ;;  %v342_v31 = vpop.f32.mrb[3].mxu0  ;;  %v424_v50 = vmul.f32 0.5, %v412_v19  ;;  %v623_v19 = vld [vmem:[#allocation11 + $0x180] sm:$0xff] }
 0x19c   :  { %1103 = verf.f32 %v432_v24  ;;  %v418_v30 = vadd.f32 %v417_v28, %v259_v12  ;;  %v419_v32 = vpop.f32.mrb[3].mxu1  ;;  %v343_v33 = vadd.f32 %v342_v31, %v255_v13  ;;  %v425_v57 = vmul.f32 0.5, %v414_v23  ;;  %v575_v22 = vld [vmem:[#allocation11] sm:$0xff]  ;;  %v576_v23 = vld [vmem:[#allocation11 + $0x8] sm:$0xff]  ;;  %v593_v28 = vld [vmem:[#allocation11 + $0x90] sm:$0xff]  ;;  %1024 = vmatprep.subr.bf16.mxu0 %v1023_v20 }
 0x19d   :  { %1105 = verf.f32 %v431_v25  ;;  %v420_v34 = vadd.f32 %v419_v32, %v263_v14  ;;  %v434_v35 = vmul.f32 0.70710677, %v341_v29  ;;  %v426_v54 = vmul.f32 0.5, %v341_v29  ;;  %v608_v27 = vld [vmem:[#allocation11 + $0x108] sm:$0xff]  ;;  %v625_v31 = vld [vmem:[#allocation11 + $0x190] sm:$0xff]  ;;  %v626_v32 = vld [vmem:[#allocation11 + $0x198] sm:$0xff] }
 0x19e   :  { %1107 = verf.f32 %v433_v26  ;;  %v436_v36 = vmul.f32 0.70710677, %v418_v30  ;;  %v435_v37 = vmul.f32 0.70710677, %v343_v33  ;;  %v427_v63 = vmul.f32 0.5, %v343_v33  ;;  %v607_v26 = vld [vmem:[#allocation11 + $0x100] sm:$0xff] }
 0x19f   :  { %1109 = verf.f32 %v434_v35  ;;  %v437_v38 = vmul.f32 0.70710677, %v420_v34  ;;  %v428_v3 = vmul.f32 0.5, %v418_v30  ;;  %v429_v12 = vmul.f32 0.5, %v420_v34  ;;  %v594_v30 = vld [vmem:[#allocation11 + $0x98] sm:$0xff]  ;;  %v577_v35 = vld [vmem:[#allocation11 + $0x10] sm:$0xff] }
 0x1a0   :  { %1111 = verf.f32 %v436_v36  ;;  %v1055_v24 = vpack.c.bf16 %v624_v21, %v623_v19  ;;  %v1025_v25 = vpack.c.bf16 %v576_v23, %v575_v22  ;;  %v1057_v29 = vpack.c.bf16 %v608_v27, %v607_v26  ;;  %v578_v36 = vld [vmem:[#allocation11 + $0x18] sm:$0xff]  ;;  %v629_v21 = vld [vmem:[#allocation11 + $0x1b0] sm:$0xff] }
 0x1a1   :  { %1113 = verf.f32 %v435_v37  ;;  %v1027_v33 = vpack.c.bf16 %v594_v30, %v593_v28  ;;  %v1059_v34 = vpack.c.bf16 %v626_v32, %v625_v31  ;;  %v609_v37 = vld [vmem:[#allocation11 + $0x110] sm:$0xff]  ;;  %v598_v20 = vld [vmem:[#allocation11 + $0xb8] sm:$0xff]  ;;  %v599_v31 = vld [vmem:[#allocation11 + $0xc0] sm:$0xff] }
 0x1a2   :  { %1115 = verf.f32 %v437_v38  ;;  %1056 = vmatprep.subr.bf16.mxu1 %v1055_v24  ;;  %1026 = vmatpush3.bf16.msra.mxu0 %v1025_v25  ;;  %v1029_v38 = vpack.c.bf16 %v578_v36, %v577_v35  ;;  %v630_v23 = vld [vmem:[#allocation11 + $0x1b8] sm:$0xff]  ;;  %v581_v24 = vld [vmem:[#allocation11 + $0x30] sm:$0xff]  ;;  %v600_v32 = vld [vmem:[#allocation11 + $0xc8] sm:$0xff] }
 0x1a3   :  { %1058 = vmatpush3.bf16.msra.mxu1 %v1057_v29  ;;  %1028 = vmatprep.subr.bf16.mxu0 %v1027_v33  ;;  %v582_v25 = vld [vmem:[#allocation11 + $0x38] sm:$0xff]  ;;  %v1067_v26 = vpack.c.bf16 %v630_v23, %v629_v21  ;;  %v613_v28 = vld [vmem:[#allocation11 + $0x130] sm:$0xff]  ;;  %v631_v33 = vld [vmem:[#allocation11 + $0x1c0] sm:$0xff] }
 0x1a4   :  { %1060 = vmatprep.subr.bf16.mxu1 %v1059_v34  ;;  %v1037_v27 = vpack.c.bf16 %v582_v25, %v581_v24  ;;  %v614_v29 = vld [vmem:[#allocation11 + $0x138] sm:$0xff]  ;;  %v1039_v34 = vpack.c.bf16 %v600_v32, %v599_v31  ;;  %v632_v35 = vld [vmem:[#allocation11 + $0x1c8] sm:$0xff]  ;;  %v583_v36 = vld [vmem:[#allocation11 + $0x40] sm:$0xff] }
 0x1a5   :  { %v1102_v39 = vpop.eup %1101  ;;  %v1069_v30 = vpack.c.bf16 %v614_v29, %v613_v28  ;;  %v621_v23 = vld [vmem:[#allocation11 + $0x170] sm:$0xff]  ;;  %v622_v24 = vld [vmem:[#allocation11 + $0x178] sm:$0xff] }
 0x1a6   :  { %v1104_v40 = vpop.eup %1103  ;;  %v446_v42 = vadd.f32 1.0, %v1102_v39  ;;  %v610_v39 = vld [vmem:[#allocation11 + $0x118] sm:$0xff]  ;;  %1030 = vmatpush3.bf16.msra.mxu0 %v1029_v38  ;;  %v1071_v38 = vpack.c.bf16 %v632_v35, %v631_v33 }
 0x1a7   :  { %v1106_v43 = vpop.eup %1105  ;;  %v448_v46 = vadd.f32 1.0, %v1104_v40  ;;  %v595_v40 = vld [vmem:[#allocation11 + $0xa0] sm:$0xff]  ;;  %v515_v33 = vld [vmem:[#allocation8] sm:$0xf] }
 0x1a8   :  { %v1108_v44 = vpop.eup %1107  ;;  %v1460_v45 = vmul.f32 %v446_v42, %v422_v41  ;;  %v447_v48 = vadd.f32 1.0, %v1106_v43  ;;  %v596_v41 = vld [vmem:[#allocation11 + $0xa8] sm:$0xff]  ;;  %v1061_v42 = vpack.c.bf16 %v610_v39, %v609_v37  ;;  %v520_v35 = vrot.slane %v515_v33, %v1448_v6 }
 0x1a9   :  { %v1110_v49 = vpop.eup %1109  ;;  %v449_v52 = vadd.f32 1.0, %v1108_v44  ;;  %v1464_v58 = vmul.f32 %v448_v46, %v424_v50  ;;  %v1031_v43 = vpack.c.bf16 %v596_v41, %v595_v40  ;;  %v627_v44 = vld [vmem:[#allocation11 + $0x1a0] sm:$0xff]  ;;  %v628_v46 = vld [vmem:[#allocation11 + $0x1a8] sm:$0xff] }
 0x1aa   :  { %v1462_v51 = vmul.f32 %v447_v48, %v423_v47  ;;  %v1112_v53 = vpop.eup %1111  ;;  %v450_v55 = vadd.f32 1.0, %v1110_v49  ;;  %v579_v47 = vld [vmem:[#allocation11 + $0x20] sm:$0xff]  ;;  %v1063_v48 = vpack.c.bf16 %v628_v46, %v627_v44  ;;  %v580_v49 = vld [vmem:[#allocation11 + $0x28] sm:$0xff]  ;;  %1062 = vmatpush3.bf16.msra.mxu1 %v1061_v42  ;;  %v602_v44 = vld [vmem:[#allocation11 + $0xd8] sm:$0xff] }
 0x1ab   :  { %v1114_v56 = vpop.eup %1113  ;;  %v452_v62 = vadd.f32 1.0, %v1112_v53  ;;  %v1470_v1 = vmul.f32 %v449_v52, %v425_v57  ;;  %v611_v50 = vld [vmem:[#allocation11 + $0x120] sm:$0xff]  ;;  %v612_v52 = vld [vmem:[#allocation11 + $0x128] sm:$0xff]  ;;  %v1033_v53 = vpack.c.bf16 %v580_v49, %v579_v47  ;;  %1032 = vmatprep.subr.bf16.mxu0 %v1031_v43  ;;  %v601_v43 = vld [vmem:[#allocation11 + $0xd0] sm:$0xff] }
 0x1ac   :  { %v462_v59 = vadd.f32 %v1462_v51, %v1460_v45  ;;  %v1116_v60 = vpop.eup %1115  ;;  %v1468_v61 = vmul.f32 %v450_v55, %v426_v54  ;;  %v451_v0 = vadd.f32 1.0, %v1114_v56  ;;  %v1065_v54 = vpack.c.bf16 %v612_v52, %v611_v50  ;;  %1064 = vmatprep.subr.bf16.mxu1 %v1063_v48  ;;  %v584_v37 = vld [vmem:[#allocation11 + $0x48] sm:$0xff]  ;;  %v615_v40 = vld [vmem:[#allocation11 + $0x140] sm:$0xff]  ;;  %v633_v46 = vld [vmem:[#allocation11 + $0x1d0] sm:$0xff] }
 0x1ad   :  { %v453_v5 = vadd.f32 1.0, %v1116_v60  ;;  %v1476_v11 = vmul.f32 %v452_v62, %v428_v3  ;;  %1034 = vmatpush3.bf16.msra.mxu0 %v1033_v53  ;;  %v1041_v39 = vpack.c.bf16 %v584_v37, %v583_v36  ;;  %v616_v41 = vld [vmem:[#allocation11 + $0x148] sm:$0xff]  ;;  %v1043_v47 = vpack.c.bf16 %v602_v44, %v601_v43  ;;  %v634_v48 = vld [vmem:[#allocation11 + $0x1d8] sm:$0xff]  ;;  %v585_v49 = vld [vmem:[#allocation11 + $0x50] sm:$0xff] }
 0x1ae   :  { %v463_v2 = vadd.f32 %v462_v59, %v1464_v58  ;;  %v1473_v4 = vmul.f32 %v451_v0, %v427_v63  ;;  %1066 = vmatpush3.bf16.msra.mxu1 %v1065_v54  ;;  %v1073_v42 = vpack.c.bf16 %v616_v41, %v615_v40  ;;  %v586_v50 = vld [vmem:[#allocation11 + $0x58] sm:$0xff]  ;;  %v1075_v52 = vpack.c.bf16 %v634_v48, %v633_v46  ;;  %v617_v54 = vld [vmem:[#allocation11 + $0x150] sm:$0xff] }
 0x1af   :  { %v1480_v14 = vmul.f32 %v453_v5, %v429_v12  ;;  %1068 = vmatprep.subr.bf16.mxu1 %v1067_v26  ;;  %v1045_v53 = vpack.c.bf16 %v586_v50, %v585_v49  ;;  %v1085_v26 = vpack.c.bf16 %v622_v24, %v621_v23  ;;  %v528_v36 = vrot.slane %v515_v33, %v1450_v8 }
 0x1b0   :  { %v464_v7 = vadd.f32 %v463_v2, %v1470_v1  ;;  %v467_v13 = vadd.f32 %v1473_v4, %v1468_v61  ;;  %v524_v37 = vrot.slane %v515_v33, %v1452_v9 }
 0x1b2   :  { %465 = vadd.xlane.f32.xlu0 %v464_v7  ;;  %v468_v15 = vadd.f32 %v467_v13, %v1476_v11  ;;  %1070 = vmatpush3.bf16.msra.mxu1 %v1069_v30 }
 0x1b3   :  { %1072 = vmatprep.subr.bf16.mxu1 %v1071_v38  ;;  %v532_v38 = vrot.slane %v515_v33, %v1454_v10 }
 0x1b4   :  { %v469_v16 = vadd.f32 %v468_v15, %v1480_v14 }
 0x1b6   :  { %470 = vadd.xlane.f32.xlu0 %v469_v16  ;;  %1074 = vmatpush3.bf16.msra.mxu1 %v1073_v42 }
 0x1b7   :  { %1076 = vmatprep.subr.bf16.mxu1 %v1075_v52 }
 0x23f   :  { %v466_v55 = vpop.xlane.xlu0 %465 }
 0x240   :  { %v473_v56 = vmul.f32 0.001953125, %v466_v55  ;;  %v618_v55 = vld [vmem:[#allocation11 + $0x158] sm:$0xff] }
 0x242   :  { %v1485_v57 = vsub.f32 %v1460_v45, %v473_v56  ;;  %v1488_v59 = vsub.f32 %v1462_v51, %v473_v56  ;;  %v1491_v60 = vsub.f32 %v1464_v58, %v473_v56  ;;  %v1494_v63 = vsub.f32 %v1470_v1, %v473_v56  ;;  %v603_v56 = vld [vmem:[#allocation11 + $0xe0] sm:$0xff] }
 0x243   :  { %v471_v62 = vpop.xlane.xlu0 %470 }
 0x244   :  { %v483_v0 = vmul.f32 %v1485_v57, %v1485_v57  ;;  %v484_v2 = vmul.f32 %v1488_v59, %v1488_v59  ;;  %v474_v3 = vmul.f32 0.001953125, %v471_v62  ;;  %v485_v45 = vmul.f32 %v1491_v60, %v1491_v60 }
 0x245   :  { %v486_v7 = vmul.f32 %v1494_v63, %v1494_v63  ;;  %v1077_v62 = vpack.c.bf16 %v618_v55, %v617_v54 }
 0x246   :  { %v491_v5 = vadd.f32 %v484_v2, %v483_v0  ;;  %v1503_v51 = vsub.f32 %v1468_v61, %v474_v3  ;;  %v1506_v58 = vsub.f32 %v1473_v4, %v474_v3  ;;  %v1509_v1 = vsub.f32 %v1476_v11, %v474_v3  ;;  %v604_v0 = vld [vmem:[#allocation11 + $0xe8] sm:$0xff]  ;;  %v635_v2 = vld [vmem:[#allocation11 + $0x1e0] sm:$0xff] }
 0x247   :  { %v1514_v13 = vsub.f32 %v1480_v14, %v474_v3  ;;  %v597_v14 = vld [vmem:[#allocation11 + $0xb0] sm:$0xff]  ;;  %v636_v3 = vld [vmem:[#allocation11 + $0x1e8] sm:$0xff]  ;;  %1078 = vmatpush3.bf16.msra.mxu1 %v1077_v62 }
 0x248   :  { %v492_v12 = vadd.f32 %v491_v5, %v485_v45  ;;  %v487_v15 = vmul.f32 %v1503_v51, %v1503_v51  ;;  %v488_v61 = vmul.f32 %v1506_v58, %v1506_v58  ;;  %v489_v4 = vmul.f32 %v1509_v1, %v1509_v1 }
 0x249   :  { %v490_v11 = vmul.f32 %v1514_v13, %v1514_v13  ;;  %v1035_v22 = vpack.c.bf16 %v598_v20, %v597_v14  ;;  %v1047_v45 = vpack.c.bf16 %v604_v0, %v603_v56  ;;  %v1079_v5 = vpack.c.bf16 %v636_v3, %v635_v2  ;;  %v638_v14 = vld [vmem:[#allocation11 + $0x1f8] sm:$0xff]  ;;  %v589_v20 = vld [vmem:[#allocation11 + $0x70] sm:$0xff] }
 0x24a   :  { %v493_v16 = vadd.f32 %v492_v12, %v486_v7  ;;  %v496_v17 = vadd.f32 %v488_v61, %v487_v15  ;;  %v587_v7 = vld [vmem:[#allocation11 + $0x60] sm:$0xff]  ;;  %v588_v12 = vld [vmem:[#allocation11 + $0x68] sm:$0xff] }
 0x24b   :  { %1036 = vmatprep.subr.bf16.mxu0 %v1035_v22  ;;  %v619_v15 = vld [vmem:[#allocation11 + $0x160] sm:$0xff]  ;;  %v1049_v61 = vpack.c.bf16 %v588_v12, %v587_v7  ;;  %1080 = vmatprep.subr.bf16.mxu1 %v1079_v5  ;;  %v590_v22 = vld [vmem:[#allocation11 + $0x78] sm:$0xff] }
 0x24c   :  { %494 = vadd.xlane.f32.xlu1 %v493_v16  ;;  %v497_v18 = vadd.f32 %v496_v17, %v489_v4  ;;  %1038 = vmatpush3.bf16.msra.mxu0 %v1037_v27  ;;  %v620_v16 = vld [vmem:[#allocation11 + $0x168] sm:$0xff]  ;;  %v605_v4 = vld [vmem:[#allocation11 + $0xf0] sm:$0xff]  ;;  %v606_v17 = vld [vmem:[#allocation11 + $0xf8] sm:$0xff]  ;;  %v1053_v25 = vpack.c.bf16 %v590_v22, %v589_v20 }
 0x24d   :  { %1040 = vmatprep.subr.bf16.mxu0 %v1039_v34  ;;  %v545_v34 = vld [vmem:[#allocation10] sm:$0xf] }
 0x24e   :  { %v498_v19 = vadd.f32 %v497_v18, %v490_v11  ;;  %v1081_v11 = vpack.c.bf16 %v620_v16, %v619_v15  ;;  %v1051_v18 = vpack.c.bf16 %v606_v17, %v605_v4  ;;  %v554_v40 = vrot.slane %v545_v34, %v1452_v9 }
 0x24f   :  { %v562_v41 = vrot.slane %v545_v34, %v1454_v10  ;;  %v550_v42 = vrot.slane %v545_v34, %v1448_v6  ;;  %v558_v43 = vrot.slane %v545_v34, %v1450_v8 }
 0x250   :  { %499 = vadd.xlane.f32.xlu1 %v498_v19  ;;  %1042 = vmatpush3.bf16.msra.mxu0 %v1041_v39  ;;  %v637_v19 = vld [vmem:[#allocation11 + $0x1f0] sm:$0xff] }
 0x251   :  { %1044 = vmatprep.subr.bf16.mxu0 %v1043_v47  ;;  %v1083_v21 = vpack.c.bf16 %v638_v14, %v637_v19  ;;  %1082 = vmatpush3.bf16.msra.mxu1 %v1081_v11 }
 0x253   :  { %1084 = vmatprep.subr.bf16.mxu1 %v1083_v21 }
 0x254   :  { %1046 = vmatpush3.bf16.msra.mxu0 %v1045_v53 }
 0x255   :  { %1048 = vmatprep.subr.bf16.mxu0 %v1047_v45  ;;  %1086 = vmatpush3.bf16.msra.mxu1 %v1085_v26 }
 0x258   :  { %1050 = vmatpush3.bf16.msra.mxu0 %v1049_v61 }
 0x259   :  { %1052 = vmatprep.subr.bf16.mxu0 %v1051_v18 }
 0x25c   :  { %1054 = vmatpush3.bf16.msra.mxu0 %v1053_v25 }
 0x2d9   :  { %v495_v27 = vpop.xlane.xlu1 %494 }
 0x2da   :  { %v501_v28 = vmul.f32 0.001953125, %v495_v27 }
 0x2dc   :  { %v503_v29 = vadd.f32 1e-05, %v501_v28 }
 0x2dd   :  { %v500_v30 = vpop.xlane.xlu1 %499 }
 0x2de   :  { %1117 = vrsqrt.f32 %v503_v29  ;;  %v502_v31 = vmul.f32 0.001953125, %v500_v30 }
 0x2e0   :  { %v504_v32 = vadd.f32 1e-05, %v502_v31 }
 0x2e2   :  { %1119 = vrsqrt.f32 %v504_v32 }
 0x2e8   :  { %v1118_v39 = vpop.eup %1117 }
 0x2e9   :  { %v508_v44 = vmul.f32 %v1118_v39, %v1488_v59  ;;  %v510_v46 = vmul.f32 %v1118_v39, %v1494_v63  ;;  %v507_v47 = vmul.f32 %v1118_v39, %v1485_v57  ;;  %v509_v48 = vmul.f32 %v1118_v39, %v1491_v60 }
 0x2eb   :  { %v538_v49 = vmul.f32 %v524_v37, %v508_v44  ;;  %v540_v50 = vmul.f32 %v532_v38, %v510_v46  ;;  %v537_v52 = vmul.f32 %v520_v35, %v507_v47  ;;  %v539_v53 = vmul.f32 %v528_v36, %v509_v48 }
 0x2ec   :  { %v1120_v54 = vpop.eup %1119 }
 0x2ed   :  { %v568_v9 = vadd.f32 %v554_v40, %v538_v49  ;;  %v570_v55 = vadd.f32 %v562_v41, %v540_v50  ;;  %v567_v10 = vadd.f32 %v550_v42, %v537_v52  ;;  %v569_v56 = vadd.f32 %v558_v43, %v539_v53 }
 0x2ee   :  { %v512_v6 = vmul.f32 %v1120_v54, %v1506_v58  ;;  %v514_v8 = vmul.f32 %v1120_v54, %v1514_v13  ;;  %v511_v59 = vmul.f32 %v1120_v54, %v1503_v51  ;;  %v513_v63 = vmul.f32 %v1120_v54, %v1509_v1  ;;  %v818_v13 = vld [vmem:[#allocation13] ss:$0 sm:$0xff] }
 0x2ef   :  { %710 = vmatprep.mubr.f32.mxu0 %v568_v9  ;;  %785 = vmatprep.mubr.f32.mxu1 %v570_v55 }
 0x2f0   :  { %711 = vmatmul.mubr.f32.vlgmr.msra.gmra.mrb[4].mxu0 %v567_v10  ;;  %786 = vmatmul.mubr.f32.vlgmr.msra.gmra.mrb[4].mxu1 %v569_v56  ;;  %v542_v57 = vmul.f32 %v524_v37, %v512_v6  ;;  %v544_v60 = vmul.f32 %v532_v38, %v514_v8  ;;  %v541_v62 = vmul.f32 %v520_v35, %v511_v59 }
 0x2f1   :  { %v543_v0 = vmul.f32 %v528_v36, %v513_v63 }
 0x2f2   :  { %v572_v2 = vadd.f32 %v554_v40, %v542_v57  ;;  %v574_v3 = vadd.f32 %v562_v41, %v544_v60  ;;  %v571_v45 = vadd.f32 %v550_v42, %v541_v62 }
 0x2f3   :  { %v573_v5 = vadd.f32 %v558_v43, %v543_v0 }
 0x2f4   :  { %715 = vmatprep.mubr.f32.mxu0 %v572_v2  ;;  %790 = vmatprep.mubr.f32.mxu1 %v574_v3 }
 0x2f5   :  { %716 = vmatmul.mubr.f32.gmra.mrb[6].mxu0 %v571_v45  ;;  %791 = vmatmul.mubr.f32.gmra.mrb[6].mxu1 %v573_v5 }
 0x3c3   :  { %v851_v58 = vpop.f32.mrb[4].mxu0  ;;  %v889_v51 = vpop.f32.mrb[4].mxu1 }
 0x3c4   :  { %v852_v1 = vpop.f32.mrb[5].mxu0  ;;  %v890_v7 = vpop.f32.mrb[5].mxu1 }
 0x3c5   :  { %v853_v12 = vadd.f32 %v852_v1, %v851_v58  ;;  %v891_v15 = vadd.f32 %v890_v7, %v889_v51 }
 0x3c7   :  { %v713_v61 = vadd.f32 %v853_v12, %v818_v13 }
 0x3c8   :  { %v854_v16 = vpop.f32.mrb[6].mxu0  ;;  %v892_v4 = vpop.f32.mrb[6].mxu1 }
 0x3c9   :  { %v788_v17 = vadd.f32 %v891_v15, %v713_v61  ;;  %v855_v11 = vpop.f32.mrb[7].mxu0  ;;  %v893_v18 = vpop.f32.mrb[7].mxu1 }
 0x3ca   :  { %v856_v19 = vadd.f32 %v855_v11, %v854_v16  ;;  %v894_v14 = vadd.f32 %v893_v18, %v892_v4 }
 0x3cb   :  { %796 = vst [vmem:[#allocation14] sm:$0xff] %v788_v17 }
 0x3cc   :  { %v718_v20 = vadd.f32 %v856_v19, %v818_v13 }
 0x3ce   :  { %v793_v21 = vadd.f32 %v894_v14, %v718_v20 }
 0x3d0   :  { %797 = vst [vmem:[#allocation14 + $0x8] sm:$0xff] %v793_v21 }
 0x3d1   :  { %1286 = shalt.err (!%p1283_p4)
}
 0x3d2   :  { %s1287_s20 = scalar_lea.hbm %s1562_s7, 256 }
 0x3d3   :  { %p1288_p5 = scmp.ne.s32.totalorder %s1562_s7, %s1287_s20  ;;  %p1291_p6 = scmp.lt.u32.totalorder %s1287_s20, %s1562_s7 }
 0x3d5   :  { %p1293_p7 = pnand %p1291_p6, %p1288_p5 }
 0x3d7   :  { %1296 = shalt.err (!%p1293_p7)
}
 0x3d8   :  { %809 = dma.vmem_to_hbm [thread:$0]  %s804_s16, 256, %s1562_s7, [#allocation4], %s1312_s3, %s1312_s3, %s1313_s13  }
 0x3d9   :  { %1305 = dma.done.wait [#allocation4], 256  }
 0x3da   :  { %1306 = vsyncadd [#allocation4], 4294967040 }
 0x3db   :  { %813 = vsyncpa [#allocation3], 1 }
 0x3dc   :  { %814 = vsyncpa [#allocation6], 1 }
 0x3dd   :  { %815 = vsyncpa [#allocation9], 1 }
 0x3de   :  { %816 = vsyncpa [#allocation12], 1 }
 0x3df   :  { %817 = vsyncpa [#allocation4], 1 }

</bundles_post_ra>
